<compile_context>
chip_gen: v5e
topology: v5e:2x2
jax: 0.10.0
libtpu: 0.0.40
codegen_flags: <defaults>
</compile_context>

<pallas_src>
import math

import jax
import jax.numpy as jnp
from jax import lax
from jax.experimental import pallas as pl
from jax.experimental.pallas import tpu as pltpu

INPUT_DIM = 128    # concat(em, eq) along last dim
HALF_DIM = 64      # each of em / eq
HIDDEN_DIM = 256
OUTPUT_DIM = 64
LN_EPS = 1e-5      # PyTorch nn.LayerNorm default
TILE_M = 512       # row tile (multiple of 256; fits easily in v7x's 64 MiB VMEM)


def _timbre_kernel(em_ref, eq_ref, eps_ref,
                   w1a_ref, w1b_ref, b1_ref,
                   wr_ref, br_ref,
                   g_ref, bt_ref,
                   wh_ref, bh_ref,
                   heads_ref, lat_ref):
    """Per-tile body.

    em/eq: (TM, 64) bf16        eps: (TM, 64) f32
    w1a/w1b: (64, 256) bf16     b1: (1, 256) f32
    wr: (5, 256, 256) bf16      br: (5, 256) f32
    g/bt: (6, 256) f32          (LayerNorm gamma / beta for the 6 blocks)
    wh: (256, 128) bf16         bh: (1, 128) f32     (fused mean|logvar head)
    heads: (TM, 128) f32 = [mean | logvar]           lat: (TM, 64) f32
    """

    def ln_relu_bf16(h, blk):
        # One-pass LayerNorm stats in f32, then ReLU; cast to bf16 for next dot.
        mu = jnp.mean(h, axis=-1, keepdims=True)
        msq = jnp.mean(h * h, axis=-1, keepdims=True)
        var = msq - mu * mu
        hn = (h - mu) * lax.rsqrt(var + LN_EPS)
        hn = hn * g_ref[blk:blk + 1, :] + bt_ref[blk:blk + 1, :]
        hn = jnp.maximum(hn, 0.0)
        return hn.astype(jnp.bfloat16)

    # Block 0: split-K Linear(128 -> 256) over the em|eq halves, + LN + ReLU.
    h = (jnp.dot(em_ref[...], w1a_ref[...], preferred_element_type=jnp.float32)
         + jnp.dot(eq_ref[...], w1b_ref[...], preferred_element_type=jnp.float32)
         + b1_ref[...])
    h = ln_relu_bf16(h, 0)

    # Blocks 1..5: Linear(256 -> 256) + LN + ReLU (statically unrolled).
    for i in range(5):
        hi = (jnp.dot(h, wr_ref[i], preferred_element_type=jnp.float32)
              + br_ref[i:i + 1, :])
        h = ln_relu_bf16(hi, i + 1)

    # Fused heads: one lane-dense (TM, 128) result = [mean | logvar].
    slab = jnp.dot(h, wh_ref[...], preferred_element_type=jnp.float32) + bh_ref[...]
    heads_ref[...] = slab

    # Reparameterize: mean + eps * exp(0.5 * logvar)   (f32 throughout).
    mean = slab[:, :OUTPUT_DIM]
    logvar = slab[:, OUTPUT_DIM:]
    lat_ref[...] = mean + eps_ref[...] * jnp.exp(0.5 * logvar)


def init_params(key):
    """Deterministic parameter init (shapes/semantics match the PyTorch module),
    pre-packed into the kernel layout (split W1, stacked hidden Linears, fused
    mean|logvar head). Matmul weights in bf16, biases / LN params in f32."""
    ks = jax.random.split(key, 8)

    def lin(k, fan_in, fan_out):
        bound = 1.0 / math.sqrt(fan_in)
        kw, kb = jax.random.split(k)
        w = jax.random.uniform(kw, (fan_in, fan_out), jnp.float32, -bound, bound)
        b = jax.random.uniform(kb, (1, fan_out), jnp.float32, -bound, bound)
        return w, b

    w1, b1 = lin(ks[0], INPUT_DIM, HIDDEN_DIM)
    wr_list, br_list = [], []
    for i in range(5):
        w, b = lin(ks[1 + i], HIDDEN_DIM, HIDDEN_DIM)
        wr_list.append(w)
        br_list.append(b[0])
    wr = jnp.stack(wr_list)                      # (5, 256, 256)
    br = jnp.stack(br_list)                      # (5, 256)

    gammas = jnp.ones((6, HIDDEN_DIM), jnp.float32)   # LayerNorm default weight
    betas = jnp.zeros((6, HIDDEN_DIM), jnp.float32)   # LayerNorm default bias

    wm, bm = lin(ks[6], HIDDEN_DIM, OUTPUT_DIM)
    wv, bv = lin(ks[7], HIDDEN_DIM, OUTPUT_DIM)

    return dict(
        w1a=w1[:HALF_DIM].astype(jnp.bfloat16),       # (64, 256) -- em half
        w1b=w1[HALF_DIM:].astype(jnp.bfloat16),       # (64, 256) -- eq half
        b1=b1,                                        # (1, 256) f32
        wr=wr.astype(jnp.bfloat16),                   # (5, 256, 256)
        br=br,                                        # (5, 256) f32
        g=gammas, bt=betas,                           # (6, 256) f32
        wh=jnp.concatenate([wm, wv], axis=1).astype(jnp.bfloat16),  # (256, 128)
        bh=jnp.concatenate([bm, bv], axis=1),         # (1, 128) f32
    )


def _round_up(x, m):
    return ((x + m - 1) // m) * m


@jax.jit
def timbre_encoder_forward(em, eq, eps, params):
    """em, eq: (..., 64) each; eps: (..., 64) standard-normal noise.
    Returns (timbre_latent, mean, logvar), each (..., 64), f32."""
    lead_shape = em.shape[:-1]
    n = math.prod(lead_shape) if lead_shape else 1

    em2 = em.reshape(n, HALF_DIM).astype(jnp.bfloat16)
    eq2 = eq.reshape(n, HALF_DIM).astype(jnp.bfloat16)
    eps2 = eps.reshape(n, OUTPUT_DIM).astype(jnp.float32)

    # Row tile: up to TILE_M; never larger than the (8-aligned) row count.
    tm = min(TILE_M, _round_up(n, 8))
    n_pad = _round_up(n, tm)
    if n_pad != n:
        pad = n_pad - n
        em2 = jnp.pad(em2, ((0, pad), (0, 0)))
        eq2 = jnp.pad(eq2, ((0, pad), (0, 0)))
        eps2 = jnp.pad(eps2, ((0, pad), (0, 0)))

    grid = (n_pad // tm,)

    row_spec_64 = pl.BlockSpec((tm, HALF_DIM), lambda i: (i, 0))
    const = lambda shape: pl.BlockSpec(shape, lambda i: (0,) * len(shape))

    in_specs = [
        row_spec_64,                                  # em
        row_spec_64,                                  # eq
        row_spec_64,                                  # eps
        const((HALF_DIM, HIDDEN_DIM)),                # w1a
        const((HALF_DIM, HIDDEN_DIM)),                # w1b
        const((1, HIDDEN_DIM)),                       # b1
        const((5, HIDDEN_DIM, HIDDEN_DIM)),           # wr
        const((5, HIDDEN_DIM)),                       # br
        const((6, HIDDEN_DIM)),                       # gamma
        const((6, HIDDEN_DIM)),                       # beta
        const((HIDDEN_DIM, 2 * OUTPUT_DIM)),          # wh (fused heads)
        const((1, 2 * OUTPUT_DIM)),                   # bh
    ]
    out_specs = (
        pl.BlockSpec((tm, 2 * OUTPUT_DIM), lambda i: (i, 0)),   # heads slab
        pl.BlockSpec((tm, OUTPUT_DIM), lambda i: (i, 0)),       # latent
    )
    out_shapes = (
        jax.ShapeDtypeStruct((n_pad, 2 * OUTPUT_DIM), jnp.float32),
        jax.ShapeDtypeStruct((n_pad, OUTPUT_DIM), jnp.float32),
    )

    heads, latent = pl.pallas_call(
        _timbre_kernel,
        out_shape=out_shapes,
        grid=grid,
        in_specs=in_specs,
        out_specs=out_specs,
        compiler_params=pltpu.CompilerParams(
            dimension_semantics=("parallel",)),
    )(em2, eq2, eps2,
      params["w1a"], params["w1b"], params["b1"],
      params["wr"], params["br"],
      params["g"], params["bt"],
      params["wh"], params["bh"])

    out_shape = lead_shape + (OUTPUT_DIM,)
    mean = heads[:n, :OUTPUT_DIM].reshape(out_shape)
    logvar = heads[:n, OUTPUT_DIM:].reshape(out_shape)
    latent = latent[:n].reshape(out_shape)
    return latent, mean, logvar


if __name__ == "__main__":
    key = jax.random.PRNGKey(0)
    k_em, k_eq, k_eps, k_par = jax.random.split(key, 4)

    # Small shapes: batch=2, seq=8, em/eq each 64 features -> concat = 128.
    B, T = 2, 8
    em = jax.random.normal(k_em, (B, T, HALF_DIM), jnp.float32)
    eq = jax.random.normal(k_eq, (B, T, HALF_DIM), jnp.float32)
    # torch.randn_like(std) equivalent noise, generated deterministically here.
    eps = jax.random.normal(k_eps, (B, T, OUTPUT_DIM), jnp.float32)

    params = init_params(k_par)

    latent, mean, logvar = timbre_encoder_forward(em, eq, eps, params)
    jax.block_until_ready((latent, mean, logvar))

    assert latent.shape == (B, T, OUTPUT_DIM)
    assert mean.shape == (B, T, OUTPUT_DIM)
    assert logvar.shape == (B, T, OUTPUT_DIM)
    assert bool(jnp.all(jnp.isfinite(latent)))
    assert bool(jnp.all(jnp.isfinite(mean)))
    assert bool(jnp.all(jnp.isfinite(logvar)))
    print("KERNEL_OK")
</pallas_src>

<mosaic_0001>
module attributes {stable_mosaic.version = 11 : i64} {
  func.func @_timbre_kernel(%arg0: i32, %arg1: memref<16x64xbf16, #tpu.memory_space<vmem>>, %arg2: memref<16x64xbf16, #tpu.memory_space<vmem>>, %arg3: memref<16x64xf32, #tpu.memory_space<vmem>>, %arg4: memref<64x256xbf16, #tpu.memory_space<vmem>>, %arg5: memref<64x256xbf16, #tpu.memory_space<vmem>>, %arg6: memref<1x256xf32, #tpu.memory_space<vmem>>, %arg7: memref<5x256x256xbf16, #tpu.memory_space<vmem>>, %arg8: memref<5x256xf32, #tpu.memory_space<vmem>>, %arg9: memref<6x256xf32, #tpu.memory_space<vmem>>, %arg10: memref<6x256xf32, #tpu.memory_space<vmem>>, %arg11: memref<256x128xbf16, #tpu.memory_space<vmem>>, %arg12: memref<1x128xf32, #tpu.memory_space<vmem>>, %arg13: memref<16x128xf32, #tpu.memory_space<vmem>>, %arg14: memref<16x64xf32, #tpu.memory_space<vmem>>) attributes {dimension_semantics = [#tpu.dimension_semantics<parallel>], iteration_bounds = array<i64: 1>, scalar_prefetch = 0 : i64, scratch_operands = 0 : i64, tpu.core_type = #tpu.core_type<tc>, window_params = [{transform_indices = @transform_0, window_bounds = array<i64: 16, 64>}, {transform_indices = @transform_1, window_bounds = array<i64: 16, 64>}, {transform_indices = @transform_2, window_bounds = array<i64: 16, 64>}, {pipeline_mode = #tpu.pipeline_mode<synchronous>, transform_indices = @transform_3, window_bounds = array<i64: 64, 256>}, {pipeline_mode = #tpu.pipeline_mode<synchronous>, transform_indices = @transform_4, window_bounds = array<i64: 64, 256>}, {pipeline_mode = #tpu.pipeline_mode<synchronous>, transform_indices = @transform_5, window_bounds = array<i64: 1, 256>}, {pipeline_mode = #tpu.pipeline_mode<synchronous>, transform_indices = @transform_6, window_bounds = array<i64: 5, 256, 256>}, {pipeline_mode = #tpu.pipeline_mode<synchronous>, transform_indices = @transform_7, window_bounds = array<i64: 5, 256>}, {pipeline_mode = #tpu.pipeline_mode<synchronous>, transform_indices = @transform_8, window_bounds = array<i64: 6, 256>}, {pipeline_mode = #tpu.pipeline_mode<synchronous>, transform_indices = @transform_9, window_bounds = array<i64: 6, 256>}, {pipeline_mode = #tpu.pipeline_mode<synchronous>, transform_indices = @transform_10, window_bounds = array<i64: 256, 128>}, {pipeline_mode = #tpu.pipeline_mode<synchronous>, transform_indices = @transform_11, window_bounds = array<i64: 1, 128>}, {transform_indices = @transform_12, window_bounds = array<i64: 16, 128>}, {transform_indices = @transform_13, window_bounds = array<i64: 16, 64>}]} {
    %c0 = arith.constant 0 : index
    %c0_0 = arith.constant 0 : index
    %0 = vector.load %arg1[%c0, %c0_0] : memref<16x64xbf16, #tpu.memory_space<vmem>>, vector<16x64xbf16>
    %c0_1 = arith.constant 0 : index
    %c0_2 = arith.constant 0 : index
    %1 = vector.load %arg4[%c0_1, %c0_2] : memref<64x256xbf16, #tpu.memory_space<vmem>>, vector<64x256xbf16>
    %cst = arith.constant dense<0.000000e+00> : vector<16x256xf32>
    %2 = tpu.matmul %0, %1, %cst {dimension_numbers = #tpu.dot_dimension_numbers<[1], [0], [0], [1], [0, 0, 1, 1], [], []>} : vector<16x64xbf16>, vector<64x256xbf16>, vector<16x256xf32> -> vector<16x256xf32>
    %c0_3 = arith.constant 0 : index
    %c0_4 = arith.constant 0 : index
    %3 = vector.load %arg2[%c0_3, %c0_4] : memref<16x64xbf16, #tpu.memory_space<vmem>>, vector<16x64xbf16>
    %c0_5 = arith.constant 0 : index
    %c0_6 = arith.constant 0 : index
    %4 = vector.load %arg5[%c0_5, %c0_6] : memref<64x256xbf16, #tpu.memory_space<vmem>>, vector<64x256xbf16>
    %cst_7 = arith.constant dense<0.000000e+00> : vector<16x256xf32>
    %5 = tpu.matmul %3, %4, %cst_7 {dimension_numbers = #tpu.dot_dimension_numbers<[1], [0], [0], [1], [0, 0, 1, 1], [], []>} : vector<16x64xbf16>, vector<64x256xbf16>, vector<16x256xf32> -> vector<16x256xf32>
    %6 = arith.addf %2, %5 : vector<16x256xf32>
    %c0_8 = arith.constant 0 : index
    %c0_9 = arith.constant 0 : index
    %7 = vector.load %arg6[%c0_8, %c0_9] : memref<1x256xf32, #tpu.memory_space<vmem>>, vector<1x256xf32>
    %8 = vector.broadcast %7 : vector<1x256xf32> to vector<16x256xf32>
    %9 = arith.addf %6, %8 : vector<16x256xf32>
    %cst_10 = arith.constant dense<0.000000e+00> : vector<16xf32>
    %10 = vector.multi_reduction <add>, %9, %cst_10 [1] : vector<16x256xf32> to vector<16xf32>
    %11 = vector.shape_cast %10 : vector<16xf32> to vector<16x1xf32>
    %cst_11 = arith.constant 2.560000e+02 : f32
    %12 = vector.broadcast %cst_11 : f32 to vector<16x1xf32>
    %13 = arith.divf %11, %12 : vector<16x1xf32>
    %14 = arith.mulf %9, %9 : vector<16x256xf32>
    %cst_12 = arith.constant dense<0.000000e+00> : vector<16xf32>
    %15 = vector.multi_reduction <add>, %14, %cst_12 [1] : vector<16x256xf32> to vector<16xf32>
    %16 = vector.shape_cast %15 : vector<16xf32> to vector<16x1xf32>
    %cst_13 = arith.constant 2.560000e+02 : f32
    %17 = vector.broadcast %cst_13 : f32 to vector<16x1xf32>
    %18 = arith.divf %16, %17 : vector<16x1xf32>
    %19 = arith.mulf %13, %13 : vector<16x1xf32>
    %20 = arith.subf %18, %19 : vector<16x1xf32>
    %21 = vector.broadcast %13 : vector<16x1xf32> to vector<16x256xf32>
    %22 = arith.subf %9, %21 : vector<16x256xf32>
    %cst_14 = arith.constant 9.99999974E-6 : f32
    %23 = vector.broadcast %cst_14 : f32 to vector<16x1xf32>
    %24 = arith.addf %20, %23 : vector<16x1xf32>
    %25 = math.rsqrt %24 : vector<16x1xf32>
    %26 = vector.broadcast %25 : vector<16x1xf32> to vector<16x256xf32>
    %27 = arith.mulf %22, %26 : vector<16x256xf32>
    %c0_15 = arith.constant 0 : index
    %c0_16 = arith.constant 0 : index
    %28 = vector.load %arg9[%c0_15, %c0_16] : memref<6x256xf32, #tpu.memory_space<vmem>>, vector<1x256xf32>
    %29 = vector.broadcast %28 : vector<1x256xf32> to vector<16x256xf32>
    %30 = arith.mulf %27, %29 : vector<16x256xf32>
    %c0_17 = arith.constant 0 : index
    %c0_18 = arith.constant 0 : index
    %31 = vector.load %arg10[%c0_17, %c0_18] : memref<6x256xf32, #tpu.memory_space<vmem>>, vector<1x256xf32>
    %32 = vector.broadcast %31 : vector<1x256xf32> to vector<16x256xf32>
    %33 = arith.addf %30, %32 : vector<16x256xf32>
    %cst_19 = arith.constant 0.000000e+00 : f32
    %34 = vector.broadcast %cst_19 : f32 to vector<16x256xf32>
    %35 = arith.maximumf %33, %34 : vector<16x256xf32>
    %36 = arith.truncf %35 : vector<16x256xf32> to vector<16x256xbf16>
    %c0_20 = arith.constant 0 : index
    %c0_21 = arith.constant 0 : index
    %c0_22 = arith.constant 0 : index
    %37 = vector.load %arg7[%c0_20, %c0_21, %c0_22] : memref<5x256x256xbf16, #tpu.memory_space<vmem>>, vector<1x256x256xbf16>
    %38 = vector.shape_cast %37 : vector<1x256x256xbf16> to vector<256x256xbf16>
    %cst_23 = arith.constant dense<0.000000e+00> : vector<16x256xf32>
    %39 = tpu.matmul %36, %38, %cst_23 {dimension_numbers = #tpu.dot_dimension_numbers<[1], [0], [0], [1], [0, 0, 1, 1], [], []>} : vector<16x256xbf16>, vector<256x256xbf16>, vector<16x256xf32> -> vector<16x256xf32>
    %c0_24 = arith.constant 0 : index
    %c0_25 = arith.constant 0 : index
    %40 = vector.load %arg8[%c0_24, %c0_25] : memref<5x256xf32, #tpu.memory_space<vmem>>, vector<1x256xf32>
    %41 = vector.broadcast %40 : vector<1x256xf32> to vector<16x256xf32>
    %42 = arith.addf %39, %41 : vector<16x256xf32>
    %cst_26 = arith.constant dense<0.000000e+00> : vector<16xf32>
    %43 = vector.multi_reduction <add>, %42, %cst_26 [1] : vector<16x256xf32> to vector<16xf32>
    %44 = vector.shape_cast %43 : vector<16xf32> to vector<16x1xf32>
    %cst_27 = arith.constant 2.560000e+02 : f32
    %45 = vector.broadcast %cst_27 : f32 to vector<16x1xf32>
    %46 = arith.divf %44, %45 : vector<16x1xf32>
    %47 = arith.mulf %42, %42 : vector<16x256xf32>
    %cst_28 = arith.constant dense<0.000000e+00> : vector<16xf32>
    %48 = vector.multi_reduction <add>, %47, %cst_28 [1] : vector<16x256xf32> to vector<16xf32>
    %49 = vector.shape_cast %48 : vector<16xf32> to vector<16x1xf32>
    %cst_29 = arith.constant 2.560000e+02 : f32
    %50 = vector.broadcast %cst_29 : f32 to vector<16x1xf32>
    %51 = arith.divf %49, %50 : vector<16x1xf32>
    %52 = arith.mulf %46, %46 : vector<16x1xf32>
    %53 = arith.subf %51, %52 : vector<16x1xf32>
    %54 = vector.broadcast %46 : vector<16x1xf32> to vector<16x256xf32>
    %55 = arith.subf %42, %54 : vector<16x256xf32>
    %cst_30 = arith.constant 9.99999974E-6 : f32
    %56 = vector.broadcast %cst_30 : f32 to vector<16x1xf32>
    %57 = arith.addf %53, %56 : vector<16x1xf32>
    %58 = math.rsqrt %57 : vector<16x1xf32>
    %59 = vector.broadcast %58 : vector<16x1xf32> to vector<16x256xf32>
    %60 = arith.mulf %55, %59 : vector<16x256xf32>
    %c1 = arith.constant 1 : index
    %c0_31 = arith.constant 0 : index
    %61 = vector.load %arg9[%c1, %c0_31] : memref<6x256xf32, #tpu.memory_space<vmem>>, vector<1x256xf32>
    %62 = vector.broadcast %61 : vector<1x256xf32> to vector<16x256xf32>
    %63 = arith.mulf %60, %62 : vector<16x256xf32>
    %c1_32 = arith.constant 1 : index
    %c0_33 = arith.constant 0 : index
    %64 = vector.load %arg10[%c1_32, %c0_33] : memref<6x256xf32, #tpu.memory_space<vmem>>, vector<1x256xf32>
    %65 = vector.broadcast %64 : vector<1x256xf32> to vector<16x256xf32>
    %66 = arith.addf %63, %65 : vector<16x256xf32>
    %cst_34 = arith.constant 0.000000e+00 : f32
    %67 = vector.broadcast %cst_34 : f32 to vector<16x256xf32>
    %68 = arith.maximumf %66, %67 : vector<16x256xf32>
    %69 = arith.truncf %68 : vector<16x256xf32> to vector<16x256xbf16>
    %c1_35 = arith.constant 1 : index
    %c0_36 = arith.constant 0 : index
    %c0_37 = arith.constant 0 : index
    %70 = vector.load %arg7[%c1_35, %c0_36, %c0_37] : memref<5x256x256xbf16, #tpu.memory_space<vmem>>, vector<1x256x256xbf16>
    %71 = vector.shape_cast %70 : vector<1x256x256xbf16> to vector<256x256xbf16>
    %cst_38 = arith.constant dense<0.000000e+00> : vector<16x256xf32>
    %72 = tpu.matmul %69, %71, %cst_38 {dimension_numbers = #tpu.dot_dimension_numbers<[1], [0], [0], [1], [0, 0, 1, 1], [], []>} : vector<16x256xbf16>, vector<256x256xbf16>, vector<16x256xf32> -> vector<16x256xf32>
    %c1_39 = arith.constant 1 : index
    %c0_40 = arith.constant 0 : index
    %73 = vector.load %arg8[%c1_39, %c0_40] : memref<5x256xf32, #tpu.memory_space<vmem>>, vector<1x256xf32>
    %74 = vector.broadcast %73 : vector<1x256xf32> to vector<16x256xf32>
    %75 = arith.addf %72, %74 : vector<16x256xf32>
    %cst_41 = arith.constant dense<0.000000e+00> : vector<16xf32>
    %76 = vector.multi_reduction <add>, %75, %cst_41 [1] : vector<16x256xf32> to vector<16xf32>
    %77 = vector.shape_cast %76 : vector<16xf32> to vector<16x1xf32>
    %cst_42 = arith.constant 2.560000e+02 : f32
    %78 = vector.broadcast %cst_42 : f32 to vector<16x1xf32>
    %79 = arith.divf %77, %78 : vector<16x1xf32>
    %80 = arith.mulf %75, %75 : vector<16x256xf32>
    %cst_43 = arith.constant dense<0.000000e+00> : vector<16xf32>
    %81 = vector.multi_reduction <add>, %80, %cst_43 [1] : vector<16x256xf32> to vector<16xf32>
    %82 = vector.shape_cast %81 : vector<16xf32> to vector<16x1xf32>
    %cst_44 = arith.constant 2.560000e+02 : f32
    %83 = vector.broadcast %cst_44 : f32 to vector<16x1xf32>
    %84 = arith.divf %82, %83 : vector<16x1xf32>
    %85 = arith.mulf %79, %79 : vector<16x1xf32>
    %86 = arith.subf %84, %85 : vector<16x1xf32>
    %87 = vector.broadcast %79 : vector<16x1xf32> to vector<16x256xf32>
    %88 = arith.subf %75, %87 : vector<16x256xf32>
    %cst_45 = arith.constant 9.99999974E-6 : f32
    %89 = vector.broadcast %cst_45 : f32 to vector<16x1xf32>
    %90 = arith.addf %86, %89 : vector<16x1xf32>
    %91 = math.rsqrt %90 : vector<16x1xf32>
    %92 = vector.broadcast %91 : vector<16x1xf32> to vector<16x256xf32>
    %93 = arith.mulf %88, %92 : vector<16x256xf32>
    %c2 = arith.constant 2 : index
    %c0_46 = arith.constant 0 : index
    %94 = vector.load %arg9[%c2, %c0_46] : memref<6x256xf32, #tpu.memory_space<vmem>>, vector<1x256xf32>
    %95 = vector.broadcast %94 : vector<1x256xf32> to vector<16x256xf32>
    %96 = arith.mulf %93, %95 : vector<16x256xf32>
    %c2_47 = arith.constant 2 : index
    %c0_48 = arith.constant 0 : index
    %97 = vector.load %arg10[%c2_47, %c0_48] : memref<6x256xf32, #tpu.memory_space<vmem>>, vector<1x256xf32>
    %98 = vector.broadcast %97 : vector<1x256xf32> to vector<16x256xf32>
    %99 = arith.addf %96, %98 : vector<16x256xf32>
    %cst_49 = arith.constant 0.000000e+00 : f32
    %100 = vector.broadcast %cst_49 : f32 to vector<16x256xf32>
    %101 = arith.maximumf %99, %100 : vector<16x256xf32>
    %102 = arith.truncf %101 : vector<16x256xf32> to vector<16x256xbf16>
    %c2_50 = arith.constant 2 : index
    %c0_51 = arith.constant 0 : index
    %c0_52 = arith.constant 0 : index
    %103 = vector.load %arg7[%c2_50, %c0_51, %c0_52] : memref<5x256x256xbf16, #tpu.memory_space<vmem>>, vector<1x256x256xbf16>
    %104 = vector.shape_cast %103 : vector<1x256x256xbf16> to vector<256x256xbf16>
    %cst_53 = arith.constant dense<0.000000e+00> : vector<16x256xf32>
    %105 = tpu.matmul %102, %104, %cst_53 {dimension_numbers = #tpu.dot_dimension_numbers<[1], [0], [0], [1], [0, 0, 1, 1], [], []>} : vector<16x256xbf16>, vector<256x256xbf16>, vector<16x256xf32> -> vector<16x256xf32>
    %c2_54 = arith.constant 2 : index
    %c0_55 = arith.constant 0 : index
    %106 = vector.load %arg8[%c2_54, %c0_55] : memref<5x256xf32, #tpu.memory_space<vmem>>, vector<1x256xf32>
    %107 = vector.broadcast %106 : vector<1x256xf32> to vector<16x256xf32>
    %108 = arith.addf %105, %107 : vector<16x256xf32>
    %cst_56 = arith.constant dense<0.000000e+00> : vector<16xf32>
    %109 = vector.multi_reduction <add>, %108, %cst_56 [1] : vector<16x256xf32> to vector<16xf32>
    %110 = vector.shape_cast %109 : vector<16xf32> to vector<16x1xf32>
    %cst_57 = arith.constant 2.560000e+02 : f32
    %111 = vector.broadcast %cst_57 : f32 to vector<16x1xf32>
    %112 = arith.divf %110, %111 : vector<16x1xf32>
    %113 = arith.mulf %108, %108 : vector<16x256xf32>
    %cst_58 = arith.constant dense<0.000000e+00> : vector<16xf32>
    %114 = vector.multi_reduction <add>, %113, %cst_58 [1] : vector<16x256xf32> to vector<16xf32>
    %115 = vector.shape_cast %114 : vector<16xf32> to vector<16x1xf32>
    %cst_59 = arith.constant 2.560000e+02 : f32
    %116 = vector.broadcast %cst_59 : f32 to vector<16x1xf32>
    %117 = arith.divf %115, %116 : vector<16x1xf32>
    %118 = arith.mulf %112, %112 : vector<16x1xf32>
    %119 = arith.subf %117, %118 : vector<16x1xf32>
    %120 = vector.broadcast %112 : vector<16x1xf32> to vector<16x256xf32>
    %121 = arith.subf %108, %120 : vector<16x256xf32>
    %cst_60 = arith.constant 9.99999974E-6 : f32
    %122 = vector.broadcast %cst_60 : f32 to vector<16x1xf32>
    %123 = arith.addf %119, %122 : vector<16x1xf32>
    %124 = math.rsqrt %123 : vector<16x1xf32>
    %125 = vector.broadcast %124 : vector<16x1xf32> to vector<16x256xf32>
    %126 = arith.mulf %121, %125 : vector<16x256xf32>
    %c3 = arith.constant 3 : index
    %c0_61 = arith.constant 0 : index
    %127 = vector.load %arg9[%c3, %c0_61] : memref<6x256xf32, #tpu.memory_space<vmem>>, vector<1x256xf32>
    %128 = vector.broadcast %127 : vector<1x256xf32> to vector<16x256xf32>
    %129 = arith.mulf %126, %128 : vector<16x256xf32>
    %c3_62 = arith.constant 3 : index
    %c0_63 = arith.constant 0 : index
    %130 = vector.load %arg10[%c3_62, %c0_63] : memref<6x256xf32, #tpu.memory_space<vmem>>, vector<1x256xf32>
    %131 = vector.broadcast %130 : vector<1x256xf32> to vector<16x256xf32>
    %132 = arith.addf %129, %131 : vector<16x256xf32>
    %cst_64 = arith.constant 0.000000e+00 : f32
    %133 = vector.broadcast %cst_64 : f32 to vector<16x256xf32>
    %134 = arith.maximumf %132, %133 : vector<16x256xf32>
    %135 = arith.truncf %134 : vector<16x256xf32> to vector<16x256xbf16>
    %c3_65 = arith.constant 3 : index
    %c0_66 = arith.constant 0 : index
    %c0_67 = arith.constant 0 : index
    %136 = vector.load %arg7[%c3_65, %c0_66, %c0_67] : memref<5x256x256xbf16, #tpu.memory_space<vmem>>, vector<1x256x256xbf16>
    %137 = vector.shape_cast %136 : vector<1x256x256xbf16> to vector<256x256xbf16>
    %cst_68 = arith.constant dense<0.000000e+00> : vector<16x256xf32>
    %138 = tpu.matmul %135, %137, %cst_68 {dimension_numbers = #tpu.dot_dimension_numbers<[1], [0], [0], [1], [0, 0, 1, 1], [], []>} : vector<16x256xbf16>, vector<256x256xbf16>, vector<16x256xf32> -> vector<16x256xf32>
    %c3_69 = arith.constant 3 : index
    %c0_70 = arith.constant 0 : index
    %139 = vector.load %arg8[%c3_69, %c0_70] : memref<5x256xf32, #tpu.memory_space<vmem>>, vector<1x256xf32>
    %140 = vector.broadcast %139 : vector<1x256xf32> to vector<16x256xf32>
    %141 = arith.addf %138, %140 : vector<16x256xf32>
    %cst_71 = arith.constant dense<0.000000e+00> : vector<16xf32>
    %142 = vector.multi_reduction <add>, %141, %cst_71 [1] : vector<16x256xf32> to vector<16xf32>
    %143 = vector.shape_cast %142 : vector<16xf32> to vector<16x1xf32>
    %cst_72 = arith.constant 2.560000e+02 : f32
    %144 = vector.broadcast %cst_72 : f32 to vector<16x1xf32>
    %145 = arith.divf %143, %144 : vector<16x1xf32>
    %146 = arith.mulf %141, %141 : vector<16x256xf32>
    %cst_73 = arith.constant dense<0.000000e+00> : vector<16xf32>
    %147 = vector.multi_reduction <add>, %146, %cst_73 [1] : vector<16x256xf32> to vector<16xf32>
    %148 = vector.shape_cast %147 : vector<16xf32> to vector<16x1xf32>
    %cst_74 = arith.constant 2.560000e+02 : f32
    %149 = vector.broadcast %cst_74 : f32 to vector<16x1xf32>
    %150 = arith.divf %148, %149 : vector<16x1xf32>
    %151 = arith.mulf %145, %145 : vector<16x1xf32>
    %152 = arith.subf %150, %151 : vector<16x1xf32>
    %153 = vector.broadcast %145 : vector<16x1xf32> to vector<16x256xf32>
    %154 = arith.subf %141, %153 : vector<16x256xf32>
    %cst_75 = arith.constant 9.99999974E-6 : f32
    %155 = vector.broadcast %cst_75 : f32 to vector<16x1xf32>
    %156 = arith.addf %152, %155 : vector<16x1xf32>
    %157 = math.rsqrt %156 : vector<16x1xf32>
    %158 = vector.broadcast %157 : vector<16x1xf32> to vector<16x256xf32>
    %159 = arith.mulf %154, %158 : vector<16x256xf32>
    %c4 = arith.constant 4 : index
    %c0_76 = arith.constant 0 : index
    %160 = vector.load %arg9[%c4, %c0_76] : memref<6x256xf32, #tpu.memory_space<vmem>>, vector<1x256xf32>
    %161 = vector.broadcast %160 : vector<1x256xf32> to vector<16x256xf32>
    %162 = arith.mulf %159, %161 : vector<16x256xf32>
    %c4_77 = arith.constant 4 : index
    %c0_78 = arith.constant 0 : index
    %163 = vector.load %arg10[%c4_77, %c0_78] : memref<6x256xf32, #tpu.memory_space<vmem>>, vector<1x256xf32>
    %164 = vector.broadcast %163 : vector<1x256xf32> to vector<16x256xf32>
    %165 = arith.addf %162, %164 : vector<16x256xf32>
    %cst_79 = arith.constant 0.000000e+00 : f32
    %166 = vector.broadcast %cst_79 : f32 to vector<16x256xf32>
    %167 = arith.maximumf %165, %166 : vector<16x256xf32>
    %168 = arith.truncf %167 : vector<16x256xf32> to vector<16x256xbf16>
    %c4_80 = arith.constant 4 : index
    %c0_81 = arith.constant 0 : index
    %c0_82 = arith.constant 0 : index
    %169 = vector.load %arg7[%c4_80, %c0_81, %c0_82] : memref<5x256x256xbf16, #tpu.memory_space<vmem>>, vector<1x256x256xbf16>
    %170 = vector.shape_cast %169 : vector<1x256x256xbf16> to vector<256x256xbf16>
    %cst_83 = arith.constant dense<0.000000e+00> : vector<16x256xf32>
    %171 = tpu.matmul %168, %170, %cst_83 {dimension_numbers = #tpu.dot_dimension_numbers<[1], [0], [0], [1], [0, 0, 1, 1], [], []>} : vector<16x256xbf16>, vector<256x256xbf16>, vector<16x256xf32> -> vector<16x256xf32>
    %c4_84 = arith.constant 4 : index
    %c0_85 = arith.constant 0 : index
    %172 = vector.load %arg8[%c4_84, %c0_85] : memref<5x256xf32, #tpu.memory_space<vmem>>, vector<1x256xf32>
    %173 = vector.broadcast %172 : vector<1x256xf32> to vector<16x256xf32>
    %174 = arith.addf %171, %173 : vector<16x256xf32>
    %cst_86 = arith.constant dense<0.000000e+00> : vector<16xf32>
    %175 = vector.multi_reduction <add>, %174, %cst_86 [1] : vector<16x256xf32> to vector<16xf32>
    %176 = vector.shape_cast %175 : vector<16xf32> to vector<16x1xf32>
    %cst_87 = arith.constant 2.560000e+02 : f32
    %177 = vector.broadcast %cst_87 : f32 to vector<16x1xf32>
    %178 = arith.divf %176, %177 : vector<16x1xf32>
    %179 = arith.mulf %174, %174 : vector<16x256xf32>
    %cst_88 = arith.constant dense<0.000000e+00> : vector<16xf32>
    %180 = vector.multi_reduction <add>, %179, %cst_88 [1] : vector<16x256xf32> to vector<16xf32>
    %181 = vector.shape_cast %180 : vector<16xf32> to vector<16x1xf32>
    %cst_89 = arith.constant 2.560000e+02 : f32
    %182 = vector.broadcast %cst_89 : f32 to vector<16x1xf32>
    %183 = arith.divf %181, %182 : vector<16x1xf32>
    %184 = arith.mulf %178, %178 : vector<16x1xf32>
    %185 = arith.subf %183, %184 : vector<16x1xf32>
    %186 = vector.broadcast %178 : vector<16x1xf32> to vector<16x256xf32>
    %187 = arith.subf %174, %186 : vector<16x256xf32>
    %cst_90 = arith.constant 9.99999974E-6 : f32
    %188 = vector.broadcast %cst_90 : f32 to vector<16x1xf32>
    %189 = arith.addf %185, %188 : vector<16x1xf32>
    %190 = math.rsqrt %189 : vector<16x1xf32>
    %191 = vector.broadcast %190 : vector<16x1xf32> to vector<16x256xf32>
    %192 = arith.mulf %187, %191 : vector<16x256xf32>
    %c5 = arith.constant 5 : index
    %c0_91 = arith.constant 0 : index
    %193 = vector.load %arg9[%c5, %c0_91] : memref<6x256xf32, #tpu.memory_space<vmem>>, vector<1x256xf32>
    %194 = vector.broadcast %193 : vector<1x256xf32> to vector<16x256xf32>
    %195 = arith.mulf %192, %194 : vector<16x256xf32>
    %c5_92 = arith.constant 5 : index
    %c0_93 = arith.constant 0 : index
    %196 = vector.load %arg10[%c5_92, %c0_93] : memref<6x256xf32, #tpu.memory_space<vmem>>, vector<1x256xf32>
    %197 = vector.broadcast %196 : vector<1x256xf32> to vector<16x256xf32>
    %198 = arith.addf %195, %197 : vector<16x256xf32>
    %cst_94 = arith.constant 0.000000e+00 : f32
    %199 = vector.broadcast %cst_94 : f32 to vector<16x256xf32>
    %200 = arith.maximumf %198, %199 : vector<16x256xf32>
    %201 = arith.truncf %200 : vector<16x256xf32> to vector<16x256xbf16>
    %c0_95 = arith.constant 0 : index
    %c0_96 = arith.constant 0 : index
    %202 = vector.load %arg11[%c0_95, %c0_96] : memref<256x128xbf16, #tpu.memory_space<vmem>>, vector<256x128xbf16>
    %cst_97 = arith.constant dense<0.000000e+00> : vector<16x128xf32>
    %203 = tpu.matmul %201, %202, %cst_97 {dimension_numbers = #tpu.dot_dimension_numbers<[1], [0], [0], [1], [0, 0, 1, 1], [], []>} : vector<16x256xbf16>, vector<256x128xbf16>, vector<16x128xf32> -> vector<16x128xf32>
    %c0_98 = arith.constant 0 : index
    %c0_99 = arith.constant 0 : index
    %204 = vector.load %arg12[%c0_98, %c0_99] : memref<1x128xf32, #tpu.memory_space<vmem>>, vector<1x128xf32>
    %205 = vector.broadcast %204 : vector<1x128xf32> to vector<16x128xf32>
    %206 = arith.addf %203, %205 : vector<16x128xf32>
    %c0_100 = arith.constant 0 : index
    %c0_101 = arith.constant 0 : index
    %207 = vector.load %arg13[%c0_100, %c0_101] : memref<16x128xf32, #tpu.memory_space<vmem>>, vector<16x128xf32>
    tpu.vector_store %arg13[%c0_100, %c0_101], %206 {strides = array<i32>} : memref<16x128xf32, #tpu.memory_space<vmem>>, vector<16x128xf32>,
    %208 = vector.extract_strided_slice %206 {offsets = [0, 0], sizes = [16, 64], strides = [1, 1]} : vector<16x128xf32> to vector<16x64xf32>
    %209 = vector.extract_strided_slice %206 {offsets = [0, 64], sizes = [16, 64], strides = [1, 1]} : vector<16x128xf32> to vector<16x64xf32>
    %c0_102 = arith.constant 0 : index
    %c0_103 = arith.constant 0 : index
    %210 = vector.load %arg3[%c0_102, %c0_103] : memref<16x64xf32, #tpu.memory_space<vmem>>, vector<16x64xf32>
    %cst_104 = arith.constant 5.000000e-01 : f32
    %211 = vector.broadcast %cst_104 : f32 to vector<16x64xf32>
    %212 = arith.mulf %211, %209 : vector<16x64xf32>
    %213 = math.exp %212 : vector<16x64xf32>
    %214 = arith.mulf %210, %213 : vector<16x64xf32>
    %215 = arith.addf %208, %214 : vector<16x64xf32>
    %c0_105 = arith.constant 0 : index
    %c0_106 = arith.constant 0 : index
    %216 = vector.load %arg14[%c0_105, %c0_106] : memref<16x64xf32, #tpu.memory_space<vmem>>, vector<16x64xf32>
    tpu.vector_store %arg14[%c0_105, %c0_106], %215 {strides = array<i32>} : memref<16x64xf32, #tpu.memory_space<vmem>>, vector<16x64xf32>,
    return
  }
  func.func @transform_0(%arg0: i32) -> (i32, i32) {
    %c0_i32 = arith.constant 0 : i32
    %c0_i32_0 = arith.constant 0 : i32
    return %arg0, %c0_i32 : i32, i32
  }
  func.func @transform_1(%arg0: i32) -> (i32, i32) {
    %c0_i32 = arith.constant 0 : i32
    %c0_i32_0 = arith.constant 0 : i32
    return %arg0, %c0_i32 : i32, i32
  }
  func.func @transform_2(%arg0: i32) -> (i32, i32) {
    %c0_i32 = arith.constant 0 : i32
    %c0_i32_0 = arith.constant 0 : i32
    return %arg0, %c0_i32 : i32, i32
  }
  func.func @transform_3(%arg0: i32) -> (i32, i32) {
    %c0_i32 = arith.constant 0 : i32
    %c0_i32_0 = arith.constant 0 : i32
    %c0_i32_1 = arith.constant 0 : i32
    return %c0_i32, %c0_i32_0 : i32, i32
  }
  func.func @transform_4(%arg0: i32) -> (i32, i32) {
    %c0_i32 = arith.constant 0 : i32
    %c0_i32_0 = arith.constant 0 : i32
    %c0_i32_1 = arith.constant 0 : i32
    return %c0_i32, %c0_i32_0 : i32, i32
  }
  func.func @transform_5(%arg0: i32) -> (i32, i32) {
    %c0_i32 = arith.constant 0 : i32
    %c0_i32_0 = arith.constant 0 : i32
    %c0_i32_1 = arith.constant 0 : i32
    return %c0_i32, %c0_i32_0 : i32, i32
  }
  func.func @transform_6(%arg0: i32) -> (i32, i32, i32) {
    %c0_i32 = arith.constant 0 : i32
    %c0_i32_0 = arith.constant 0 : i32
    %c0_i32_1 = arith.constant 0 : i32
    %c0_i32_2 = arith.constant 0 : i32
    return %c0_i32, %c0_i32_0, %c0_i32_1 : i32, i32, i32
  }
  func.func @transform_7(%arg0: i32) -> (i32, i32) {
    %c0_i32 = arith.constant 0 : i32
    %c0_i32_0 = arith.constant 0 : i32
    %c0_i32_1 = arith.constant 0 : i32
    return %c0_i32, %c0_i32_0 : i32, i32
  }
  func.func @transform_8(%arg0: i32) -> (i32, i32) {
    %c0_i32 = arith.constant 0 : i32
    %c0_i32_0 = arith.constant 0 : i32
    %c0_i32_1 = arith.constant 0 : i32
    return %c0_i32, %c0_i32_0 : i32, i32
  }
  func.func @transform_9(%arg0: i32) -> (i32, i32) {
    %c0_i32 = arith.constant 0 : i32
    %c0_i32_0 = arith.constant 0 : i32
    %c0_i32_1 = arith.constant 0 : i32
    return %c0_i32, %c0_i32_0 : i32, i32
  }
  func.func @transform_10(%arg0: i32) -> (i32, i32) {
    %c0_i32 = arith.constant 0 : i32
    %c0_i32_0 = arith.constant 0 : i32
    %c0_i32_1 = arith.constant 0 : i32
    return %c0_i32, %c0_i32_0 : i32, i32
  }
  func.func @transform_11(%arg0: i32) -> (i32, i32) {
    %c0_i32 = arith.constant 0 : i32
    %c0_i32_0 = arith.constant 0 : i32
    %c0_i32_1 = arith.constant 0 : i32
    return %c0_i32, %c0_i32_0 : i32, i32
  }
  func.func @transform_12(%arg0: i32) -> (i32, i32) {
    %c0_i32 = arith.constant 0 : i32
    %c0_i32_0 = arith.constant 0 : i32
    return %arg0, %c0_i32 : i32, i32
  }
  func.func @transform_13(%arg0: i32) -> (i32, i32) {
    %c0_i32 = arith.constant 0 : i32
    %c0_i32_0 = arith.constant 0 : i32
    return %arg0, %c0_i32 : i32, i32
  }
}

</mosaic_0001>

<bundles_post_ra>
// kernel: timbre_encoder_forward.1
= control target key start
LH: loop header
LB: loop body
LE: loop exit
PB: predicated region body
PF: predicated region fallthrough
CT: control target
= control target key end

     0   :  { %19 = vsyncpa [#allocation3], 0  ;;  %s3873_s0 = inlined_call_operand.vmem [shape: bf16[16,64], index: 0, kind: input, shape index: {}]   ;;  %s3874_s1 = inlined_call_operand.vmem [shape: bf16[16,64], index: 1, kind: input, shape index: {}]   ;;  %s3875_s2 = inlined_call_operand.vmem [shape: f32[16,64], index: 2, kind: input, shape index: {}]   ;;  %s3876_s3 = inlined_call_operand.hbm [shape: bf16[64,256], index: 3, kind: input, shape index: {}]   ;;  %s3877_s4 = inlined_call_operand.hbm [shape: bf16[64,256], index: 4, kind: input, shape index: {}]   ;;  %s3878_s5 = inlined_call_operand.vmem [shape: f32[1,256], index: 5, kind: input, shape index: {}]   ;;  %s3879_s6 = inlined_call_operand.hbm [shape: bf16[5,256,256], index: 6, kind: input, shape index: {}]   ;;  %s3880_s7 = inlined_call_operand.vmem [shape: f32[5,256], index: 7, kind: input, shape index: {}]   ;;  %s3881_s8 = inlined_call_operand.hbm [shape: f32[6,256], index: 8, kind: input, shape index: {}]   ;;  %s3882_s9 = inlined_call_operand.hbm [shape: f32[6,256], index: 9, kind: input, shape index: {}]   ;;  %s3883_s10 = inlined_call_operand.hbm [shape: bf16[256,128], index: 10, kind: input, shape index: {}]   ;;  %s3884_s11 = inlined_call_operand.vmem [shape: f32[1,128], index: 11, kind: input, shape index: {}]   ;;  %s3885_s12 = inlined_call_operand.vmem [shape: f32[16,128], index: 12, kind: output, shape index: {0}]   ;;  %s3886_s13 = inlined_call_operand.hbm [shape: f32[16,64], index: 13, kind: output, shape index: {1}]  }
   0x1   :  { %20 = vsyncpa [#allocation6], 0 }
   0x2   :  { %21 = vsyncpa [#allocation9], 0 }
   0x3   :  { %22 = vsyncpa [#allocation12], 0 }
   0x4   :  { %23 = vsyncpa [#allocation4], 0  ;;  %s47_s27 = sshll.u32 %s3877_s4, 4  ;;  %s3502_s28 = smov [#allocation5]   ;;  %s48_s27 = int_to_ptr.hbm [resolvable:$true] %s47_s27 }
   0x5   :  { %s49_s29 = sshll.u32 %s3502_s28, 4  ;;  %s78_s15 = sshll.u32 %s3881_s8, 4  ;;  %s50_s29 = int_to_ptr.vmem [resolvable:$true] %s49_s29  ;;  %s79_s15 = int_to_ptr.hbm [resolvable:$true] %s78_s15 }
   0x6   :  { %s3503_s16 = smov 128   ;;  %s3504_s17 = smov 8  }
   0x7   :  { %55 = dma.hbm_to_vmem [thread:$0]  %s48_s27, 1024, %s50_s29, [#allocation6], %s3503_s16, %s3503_s16, %s3504_s17  }
   0x8   :  { %s3505_s18 = smov [#allocation8]   ;;  %s34_s4 = sshll.u32 %s3876_s3, 4  ;;  %s35_s4 = int_to_ptr.hbm [resolvable:$true] %s34_s4 }
   0x9   :  { %s80_s19 = sshll.u32 %s3505_s18, 4  ;;  %s62_s8 = sshll.u32 %s3879_s6, 4  ;;  %s81_s19 = int_to_ptr.vmem [resolvable:$true] %s80_s19  ;;  %s63_s8 = int_to_ptr.hbm [resolvable:$true] %s62_s8 }
   0xa   :  { %83 = dma.hbm_to_vmem [thread:$0]  %s79_s15, 256, %s81_s19, [#allocation9]  }
   0xb   :  { %s3506_s24 = smov [#allocation2]   ;;  %s3507_s26 = smov [#allocation7]  }
   0xc   :  { %s36_s25 = sshll.u32 %s3506_s24, 4  ;;  %s64_s27 = sshll.u32 %s3507_s26, 4  ;;  %s37_s25 = int_to_ptr.vmem [resolvable:$true] %s36_s25  ;;  %s65_s27 = int_to_ptr.vmem [resolvable:$true] %s64_s27 }
   0xd   :  { %42 = dma.hbm_to_vmem [thread:$0]  %s35_s4, 1024, %s37_s25, [#allocation3], %s3503_s16, %s3503_s16, %s3504_s17  }
   0xe   :  { %s89_s3 = sshll.u32 %s3882_s9, 4  ;;  %s99_s14 = sshll.u32 %s3883_s10, 4  ;;  %s90_s3 = int_to_ptr.hbm [resolvable:$true] %s89_s3  ;;  %s100_s14 = int_to_ptr.hbm [resolvable:$true] %s99_s14 }
   0xf   :  { %70 = dma.hbm_to_vmem [thread:$0]  %s63_s8, 20480, %s65_s27, [#allocation6], %s3503_s16, %s3503_s16, %s3504_s17  }
  0x10   :  { %s3508_s15 = smov [#allocation10]   ;;  %s3509_s19 = smov [#allocation11]  }
  0x11   :  { %s91_s18 = sshll.u32 %s3508_s15, 4  ;;  %s101_s20 = sshll.u32 %s3509_s19, 4  ;;  %s92_s18 = int_to_ptr.vmem [resolvable:$true] %s91_s18  ;;  %s102_s20 = int_to_ptr.vmem [resolvable:$true] %s101_s20 }
  0x12   :  { %94 = dma.hbm_to_vmem [thread:$0]  %s90_s3, 256, %s92_s18, [#allocation9]  }
  0x13   :  { %s3510_s21 = smov 64   ;;  %s3511_s9 = smov 4  }
  0x14   :  { %107 = dma.hbm_to_vmem [thread:$0]  %s100_s14, 2048, %s102_s20, [#allocation12], %s3510_s21, %s3510_s21, %s3511_s9  }
  0x15   :  { %3492 = dma.done.wait [#allocation3], 1024  }
  0x16   :  { %3493 = vsyncadd [#allocation3], 4294966272 }
  0x17   :  { %3494 = dma.done.wait [#allocation6], 21504  }
  0x18   :  { %3495 = vsyncadd [#allocation6], 4294945792 }
  0x19   :  { %3496 = dma.done.wait [#allocation9], 512  }
  0x1a   :  { %3497 = vsyncadd [#allocation9], 4294966784 }
  0x1b   :  { %3498 = dma.done.wait [#allocation12], 2048  }
  0x1c   :  { %3499 = vsyncadd [#allocation12], 4294965248  ;;  %v2333_v0 = vld [vmem:[#allocation5 + $0x30] sm:$0xf]  ;;  %v3104_v1 = vld [vmem:[#allocation5 + $0x34] sm:$0xf0] }
  0x1d   :  { %v3103_v2 = vld [vmem:[#allocation5 + $0x34] sm:$0xf]  ;;  %v2334_v3 = vor.u32 %v3104_v1, %v2333_v0  ;;  %v2335_v4 = vld [vmem:[#allocation5 + $0x38] sm:$0xf0]  ;;  %v2325_v5 = vld [vmem:[#allocation5 + $0x20] sm:$0xf] }
  0x1e   :  { %v3102_v6 = vld [vmem:[#allocation5 + $0x24] sm:$0xf0]  ;;  %v2338_v7 = vor.u32 %v3103_v2, %v2335_v4  ;;  %v3101_v8 = vld [vmem:[#allocation5 + $0x24] sm:$0xf]  ;;  %v2327_v9 = vld [vmem:[#allocation5 + $0x28] sm:$0xf0] }
  0x1f   :  { %208 = vmatpush.bf16.msra.mxu2 %v2334_v3  ;;  %v2326_v10 = vor.u32 %v3102_v6, %v2325_v5  ;;  %v2330_v11 = vor.u32 %v3101_v8, %v2327_v9  ;;  %v2317_v12 = vld [vmem:[#allocation5 + $0x10] sm:$0xf]  ;;  %v3100_v13 = vld [vmem:[#allocation5 + $0x14] sm:$0xf0]  ;;  %v3099_v14 = vld [vmem:[#allocation5 + $0x14] sm:$0xf] }
  0x20   :  { %222 = vmatpush.bf16.msra.mxu3 %v2338_v7  ;;  %v2319_v15 = vld [vmem:[#allocation5 + $0x18] sm:$0xf0]  ;;  %v2318_v16 = vor.u32 %v3100_v13, %v2317_v12  ;;  %v2309_v18 = vld [vmem:[#allocation5] sm:$0xf]  ;;  %v3098_v19 = vld [vmem:[#allocation5 + $0x4] sm:$0xf0] }
  0x21   :  { %v2322_v17 = vor.u32 %v3099_v14, %v2319_v15  ;;  %v3097_v20 = vld [vmem:[#allocation5 + $0x4] sm:$0xf]  ;;  %v2311_v21 = vld [vmem:[#allocation5 + $0x8] sm:$0xf0]  ;;  %v2371_v22 = vld [vmem:[#allocation2 + $0x30] sm:$0xf]  ;;  %v2310_v26 = vor.u32 %v3098_v19, %v2309_v18 }
  0x22   :  { %v3095_v23 = vld [vmem:[#allocation2 + $0x34] sm:$0xf0]  ;;  %v3094_v24 = vld [vmem:[#allocation2 + $0x34] sm:$0xf]  ;;  %v2373_v25 = vld [vmem:[#allocation2 + $0x38] sm:$0xf0]  ;;  %v2314_v27 = vor.u32 %v3097_v20, %v2311_v21 }
  0x23   :  { %209 = vmatpush.bf16.msra.mxu2 %v2326_v10  ;;  %v2372_v28 = vor.u32 %v3095_v23, %v2371_v22  ;;  %v2376_v29 = vor.u32 %v3094_v24, %v2373_v25  ;;  %v2363_v30 = vld [vmem:[#allocation2 + $0x20] sm:$0xf]  ;;  %v3093_v31 = vld [vmem:[#allocation2 + $0x24] sm:$0xf0]  ;;  %v3092_v33 = vld [vmem:[#allocation2 + $0x24] sm:$0xf] }
  0x24   :  { %223 = vmatpush.bf16.msra.mxu3 %v2330_v11  ;;  %v3096_v32 = vld [vmem:[%s3874_s1] sm:$0xff]  ;;  %v2365_v34 = vld [vmem:[#allocation2 + $0x28] sm:$0xf0]  ;;  %vm200_vm0 = vcmask 523264   ;;  %v2364_v35 = vor.u32 %v3093_v31, %v2363_v30  ;;  %v2355_v37 = vld [vmem:[#allocation2 + $0x10] sm:$0xf] }
  0x25   :  { %v2368_v36 = vor.u32 %v3092_v33, %v2365_v34  ;;  %v3091_v38 = vld [vmem:[#allocation2 + $0x14] sm:$0xf0]  ;;  %v3090_v39 = vld [vmem:[#allocation2 + $0x14] sm:$0xf]  ;;  %v2357_v40 = vld [vmem:[#allocation2 + $0x18] sm:$0xf0] }
  0x26   :  { %v2356_v41 = vor.u32 %v3091_v38, %v2355_v37  ;;  %v2360_v42 = vor.u32 %v3090_v39, %v2357_v40  ;;  %v2347_v43 = vld [vmem:[#allocation2] sm:$0xf]  ;;  %v3089_v44 = vld [vmem:[#allocation2 + $0x4] sm:$0xf0]  ;;  %v3088_v45 = vld [vmem:[#allocation2 + $0x4] sm:$0xf] }
  0x27   :  { %210 = vmatpush.bf16.msra.mxu2 %v2318_v16  ;;  %v2349_v46 = vld [vmem:[#allocation2 + $0x8] sm:$0xf0]  ;;  %v2348_v47 = vor.u32 %v3089_v44, %v2347_v43  ;;  %v3087_v49 = vld [vmem:[%s3873_s0] sm:$0xff]  ;;  %v3512_v13 = vmov 256.0   ;;  %v2437_v15 = vld [vmem:[#allocation7 + $0x70] sm:$0xf] }
  0x28   :  { %224 = vmatpush.bf16.msra.mxu3 %v2322_v17  ;;  %v2352_v48 = vor.u32 %v3088_v45, %v2349_v46  ;;  %v308_v54 = vld [vmem:[%s3878_s5] sm:$0x3]  ;;  %3294 = vrcp.f32 %v3512_v13  ;;  %v3120_v16 = vld [vmem:[#allocation7 + $0x74] sm:$0xf0]  ;;  %v2501_v17 = vld [vmem:[#allocation7 + $0xf0] sm:$0xf] }
  0x29   :  { %v310_v55 = vperm.slane %v308_v54, 0  ;;  %v311_v57 = vperm.slane %v308_v54, 1  ;;  %v2438_v18 = vor.u32 %v3120_v16, %v2437_v15  ;;  %v3136_v19 = vld [vmem:[#allocation7 + $0xf4] sm:$0xf0]  ;;  %v3119_v20 = vld [vmem:[#allocation7 + $0x74] sm:$0xf] }
  0x2a   :  { %v2439_v21 = vld [vmem:[#allocation7 + $0x78] sm:$0xf0]  ;;  %v2502_v22 = vor.u32 %v3136_v19, %v2501_v17  ;;  %v3135_v24 = vld [vmem:[#allocation7 + $0xf4] sm:$0xf]  ;;  %v2493_v30 = vld [vmem:[#allocation7 + $0xe0] sm:$0xf] }
  0x2b   :  { %211 = vmatpush.bf16.msra.mxu2 %v2310_v26  ;;  %v2442_v23 = vor.u32 %v3119_v20, %v2439_v21  ;;  %v2503_v25 = vld [vmem:[#allocation7 + $0xf8] sm:$0xf0]  ;;  %603 = vmatpush.bf16.msra.mxu0 %v2438_v18  ;;  %v3117_v33 = vld [vmem:[#allocation7 + $0x64] sm:$0xf]  ;;  %v2431_v34 = vld [vmem:[#allocation7 + $0x68] sm:$0xf0] }
  0x2c   :  { %225 = vmatpush.bf16.msra.mxu3 %v2314_v27  ;;  %v2506_v27 = vor.u32 %v3135_v24, %v2503_v25  ;;  %617 = vmatpush.bf16.msra.mxu1 %v2502_v22  ;;  %v3133_v37 = vld [vmem:[#allocation7 + $0xe4] sm:$0xf]  ;;  %v2495_v38 = vld [vmem:[#allocation7 + $0xe8] sm:$0xf0]  ;;  %v2485_v43 = vld [vmem:[#allocation7 + $0xd0] sm:$0xf] }
  0x2d   :  { %v2498_v40 = vor.u32 %v3133_v37, %v2495_v38  ;;  %v3132_v45 = vld [vmem:[#allocation7 + $0xd4] sm:$0xf0]  ;;  %v3115_v46 = vld [vmem:[#allocation7 + $0x54] sm:$0xf]  ;;  %v2413_v54 = vld [vmem:[#allocation7 + $0x40] sm:$0xf] }
  0x2e   :  { %2339 = vmatmul.msk.bf16.vlgmr.msra.gmra.mxu2 %vm200_vm0, %v3096_v32  ;;  %v3646_v14 = vpop.eup %3294  ;;  %v2407_v13 = vld [vmem:[#allocation7 + $0x38] sm:$0xf0]  ;;  %v3127_v17 = vld [vmem:[#allocation7 + $0xb4] sm:$0xf]  ;;  %v2397_v21 = vld [vmem:[#allocation7 + $0x20] sm:$0xf] }
  0x2f   :  { %284 = vmatpush.bf16.msrb.mxu2 %v2372_v28  ;;  %2340 = vmatmul.msk.bf16.vlgmr.msra.gmra.mxu3 %vm200_vm0, %v3096_v32  ;;  %v325_v26 = vmul.f32 256.0, %v3646_v14  ;;  %v2429_v28 = vld [vmem:[#allocation7 + $0x60] sm:$0xf]  ;;  %v3134_v32 = vld [vmem:[#allocation7 + $0xe4] sm:$0xf0]  ;;  %vm329_vm1 = vweird.f32 %v3646_v14  ;;  %s3513_s10 = smov [#allocation13]  }
  0x30   :  { %298 = vmatpush.bf16.msrb.mxu3 %v2376_v29  ;;  %v3118_v29 = vld [vmem:[#allocation7 + $0x64] sm:$0xf0]  ;;  %v2471_v18 = vld [vmem:[#allocation7 + $0xb8] sm:$0xf0]  ;;  %v2453_v37 = vld [vmem:[#allocation7 + $0x90] sm:$0xf] }
  0x31   :  { %v2430_v31 = vor.u32 %v3118_v29, %v2429_v28  ;;  %v326_v39 = vsub.f32 1.0, %v325_v26  ;;  %v2474_v20 = vor.u32 %v3127_v17, %v2471_v18  ;;  %v3110_v22 = vld [vmem:[#allocation7 + $0x24] sm:$0xf0]  ;;  %v2399_v28 = vld [vmem:[#allocation7 + $0x28] sm:$0xf0]  ;;  %s2283_s4 = sshll.u32 %s3513_s10, 4  ;;  %s2284_s4 = int_to_ptr.vmem [resolvable:$true] %s2283_s4 }
  0x32   :  { %v2398_v25 = vor.u32 %v3110_v22, %v2397_v21  ;;  %v3126_v26 = vld [vmem:[#allocation7 + $0xa4] sm:$0xf0]  ;;  %v3124_v38 = vld [vmem:[#allocation7 + $0x94] sm:$0xf0] }
  0x33   :  { %285 = vmatpush.bf16.msrb.mxu2 %v2364_v35  ;;  %v2494_v35 = vor.u32 %v3134_v32, %v2493_v30  ;;  %604 = vmatpush.bf16.msra.mxu0 %v2430_v31  ;;  %v2463_v32 = vld [vmem:[#allocation7 + $0xa8] sm:$0xf0]  ;;  %v379_v22 = vld [vmem:[#allocation8] ss:$8 sm:$0x3] }
  0x34   :  { %299 = vmatpush.bf16.msrb.mxu3 %v2368_v36  ;;  %v2434_v36 = vor.u32 %v3117_v33, %v2431_v34  ;;  %v2389_v33 = vld [vmem:[#allocation7 + $0x10] sm:$0xf] }
  0x35   :  { %618 = vmatpush.bf16.msra.mxu1 %v2494_v35 }
  0x37   :  { %286 = vmatpush.bf16.msrb.mxu2 %v2356_v41  ;;  %v2421_v41 = vld [vmem:[#allocation7 + $0x50] sm:$0xf] }
  0x38   :  { %300 = vmatpush.bf16.msrb.mxu3 %v2360_v42  ;;  %v3116_v42 = vld [vmem:[#allocation7 + $0x54] sm:$0xf0] }
  0x39   :  { %v2422_v44 = vor.u32 %v3116_v42, %v2421_v41  ;;  %v3107_v41 = vld [vmem:[#allocation7 + $0x14] sm:$0xf]  ;;  %v2391_v42 = vld [vmem:[#allocation7 + $0x18] sm:$0xf0] }
  0x3b   :  { %287 = vmatpush.bf16.msrb.mxu2 %v2348_v47  ;;  %v2423_v47 = vld [vmem:[#allocation7 + $0x58] sm:$0xf0]  ;;  %605 = vmatpush.bf16.msra.mxu0 %v2422_v44 }
  0x3c   :  { %301 = vmatpush.bf16.msrb.mxu3 %v2352_v48  ;;  %v2486_v48 = vor.u32 %v3132_v45, %v2485_v43  ;;  %v3123_v43 = vld [vmem:[#allocation7 + $0x94] sm:$0xf]  ;;  %v2454_v45 = vor.u32 %v3124_v38, %v2453_v37 }
  0x3e   :  { %2377 = vmatmul.msk.bf16.vlgmr.msrb.gmra.mxu2 %vm200_vm0, %v3087_v49  ;;  %619 = vmatpush.bf16.msra.mxu1 %v2486_v48  ;;  %v2381_v48 = vld [vmem:[#allocation7] sm:$0xf] }
  0x3f   :  { %2378 = vmatmul.msk.bf16.vlgmr.msrb.gmra.mxu3 %vm200_vm0, %v3087_v49  ;;  %631 = vmatpush.bf16.msra.mxu2 %v2442_v23  ;;  %v2426_v49 = vor.u32 %v3115_v46, %v2423_v47  ;;  %v2461_v23 = vld [vmem:[#allocation7 + $0xa0] sm:$0xf]  ;;  %v2394_v46 = vor.u32 %v3107_v41, %v2391_v42  ;;  %v2455_v47 = vld [vmem:[#allocation7 + $0x98] sm:$0xf0] }
  0x40   :  { %645 = vmatpush.bf16.msra.mxu3 %v2506_v27  ;;  %v3109_v27 = vld [vmem:[#allocation7 + $0x24] sm:$0xf]  ;;  %v2462_v30 = vor.u32 %v3126_v26, %v2461_v23 }
  0x41   :  { %v2402_v31 = vor.u32 %v3109_v27, %v2399_v28  ;;  %v381_v27 = vperm.slane %v379_v22, 0  ;;  %v389_v28 = vld [vmem:[#allocation10] ss:$8 sm:$0x3] }
  0x43   :  { %632 = vmatpush.bf16.msra.mxu2 %v2434_v36  ;;  %v3108_v36 = vld [vmem:[#allocation7 + $0x14] sm:$0xf0] }
  0x44   :  { %646 = vmatpush.bf16.msra.mxu3 %v2498_v40  ;;  %v2390_v44 = vor.u32 %v3108_v36, %v2389_v33  ;;  %v391_v33 = vperm.slane %v389_v28, 0 }
  0x47   :  { %633 = vmatpush.bf16.msra.mxu2 %v2426_v49  ;;  %v3106_v49 = vld [vmem:[#allocation7 + $0x4] sm:$0xf0] }
  0xb1   :  { %v213_v50 = vpop.f32.mrf.mxu2 }
  0xb2   :  { %v227_v51 = vpop.f32.mrf.mxu3 }
  0xb9   :  { %v215_v52 = vpop.f32.mrf.mxu2 }
  0xba   :  { %v229_v53 = vpop.f32.mrf.mxu3 }
  0xc1   :  { %v289_v56 = vpop.f32.mrf.mxu2 }
  0xc2   :  { %v290_v58 = vadd.f32 %v289_v56, %v213_v50  ;;  %v303_v59 = vpop.f32.mrf.mxu3  ;;  %v3131_v50 = vld [vmem:[#allocation7 + $0xd4] sm:$0xf]  ;;  %v2477_v56 = vld [vmem:[#allocation7 + $0xc0] sm:$0xf] }
  0xc3   :  { %v304_v60 = vadd.f32 %v303_v59, %v227_v51  ;;  %v2487_v51 = vld [vmem:[#allocation7 + $0xd8] sm:$0xf0]  ;;  %v3113_v59 = vld [vmem:[#allocation7 + $0x44] sm:$0xf] }
  0xc4   :  { %v3626_v61 = vadd.f32 %v310_v55, %v290_v58  ;;  %v3130_v58 = vld [vmem:[#allocation7 + $0xc4] sm:$0xf0] }
  0xc5   :  { %v3628_v62 = vadd.f32 %v311_v57, %v304_v60  ;;  %v2415_v60 = vld [vmem:[#allocation7 + $0x48] sm:$0xf0] }
  0xc6   :  { %v333_v63 = vmul.f32 %v3626_v61, %v3626_v61 }
  0xc7   :  { %v318_v0 = vadd.f32 %v3628_v62, %v3626_v61  ;;  %v334_v1 = vmul.f32 %v3628_v62, %v3628_v62 }
  0xc9   :  { %319 = vadd.xlane.f32.xlu0 %v318_v0  ;;  %v291_v2 = vpop.f32.mrf.mxu2  ;;  %v337_v3 = vadd.f32 %v334_v1, %v333_v63  ;;  %v2478_v63 = vor.u32 %v3130_v58, %v2477_v56  ;;  %v2418_v0 = vor.u32 %v3113_v59, %v2415_v60  ;;  %v3129_v1 = vld [vmem:[#allocation7 + $0xc4] sm:$0xf]  ;;  %v2383_v56 = vld [vmem:[#allocation7 + $0x8] sm:$0xf0] }
  0xca   :  { %v292_v4 = vadd.f32 %v291_v2, %v215_v52  ;;  %v305_v5 = vpop.f32.mrf.mxu3  ;;  %v327_v52 = vmul.f32 %v3646_v14, %v326_v39  ;;  %v2479_v2 = vld [vmem:[#allocation7 + $0xc8] sm:$0xf0] }
  0xcb   :  { %v306_v6 = vadd.f32 %v305_v5, %v229_v53  ;;  %338 = vadd.xlane.f32.xlu1 %v337_v3  ;;  %v2490_v53 = vor.u32 %v3131_v50, %v2487_v51  ;;  %620 = vmatpush.bf16.msra.mxu1 %v2478_v63  ;;  %v2405_v5 = vld [vmem:[#allocation7 + $0x30] sm:$0xf]  ;;  %v2458_v51 = vor.u32 %v3123_v43, %v2455_v47  ;;  %v2447_v58 = vld [vmem:[#allocation7 + $0x88] sm:$0xf0] }
  0xcc   :  { %v3636_v7 = vadd.f32 %v310_v55, %v292_v4  ;;  %v3114_v55 = vld [vmem:[#allocation7 + $0x44] sm:$0xf0]  ;;  %v328_v3 = vadd.f32 %v3646_v14, %v327_v52  ;;  %v2482_v4 = vor.u32 %v3129_v1, %v2479_v2  ;;  %634 = vmatpush.bf16.msra.mxu2 %v2418_v0  ;;  %v2445_v52 = vld [vmem:[#allocation7 + $0x80] sm:$0xf] }
  0xcd   :  { %v3638_v8 = vadd.f32 %v311_v57, %v306_v6  ;;  %647 = vmatpush.bf16.msra.mxu3 %v2490_v53  ;;  %v2414_v57 = vor.u32 %v3114_v55, %v2413_v54  ;;  %v3112_v6 = vld [vmem:[#allocation7 + $0x34] sm:$0xf0]  ;;  %v3122_v53 = vld [vmem:[#allocation7 + $0x84] sm:$0xf0]  ;;  %v3105_v54 = vld [vmem:[#allocation7 + $0x4] sm:$0xf]  ;;  %v2382_v55 = vor.u32 %v3106_v49, %v2381_v48 }
  0xce   :  { %v335_v9 = vmul.f32 %v3636_v7, %v3636_v7  ;;  %v3653_v19 = vsel %vm329_vm1, %v3646_v14, %v328_v3  ;;  %v3125_v14 = vld [vmem:[#allocation7 + $0xa4] sm:$0xf]  ;;  %v2446_v60 = vor.u32 %v3122_v53, %v2445_v52  ;;  %v2386_v0 = vor.u32 %v3105_v54, %v2383_v56 }
  0xcf   :  { %v321_v10 = vadd.f32 %v3638_v8, %v3636_v7  ;;  %v336_v11 = vmul.f32 %v3638_v8, %v3638_v8  ;;  %606 = vmatpush.bf16.msra.mxu0 %v2414_v57  ;;  %v2466_v35 = vor.u32 %v3125_v14, %v2463_v32  ;;  %v3121_v57 = vld [vmem:[#allocation7 + $0x84] sm:$0xf] }
  0xd0   :  { %v2450_v1 = vor.u32 %v3121_v57, %v2447_v58 }
  0xd1   :  { %322 = vadd.xlane.f32.xlu0 %v321_v10  ;;  %v340_v12 = vadd.f32 %v336_v11, %v335_v9  ;;  %v2469_v9 = vld [vmem:[#allocation7 + $0xb0] sm:$0xf]  ;;  %648 = vmatpush.bf16.msra.mxu3 %v2482_v4  ;;  %v2406_v10 = vor.u32 %v3112_v6, %v2405_v5  ;;  %v3128_v11 = vld [vmem:[#allocation7 + $0xb4] sm:$0xf0] }
  0xd2   :  { %v2470_v15 = vor.u32 %v3128_v11, %v2469_v9 }
  0xd3   :  { %341 = vadd.xlane.f32.xlu1 %v340_v12  ;;  %v3111_v12 = vld [vmem:[#allocation7 + $0x34] sm:$0xf]  ;;  %607 = vmatpush.bf16.msra.mxu0 %v2406_v10 }
  0xd4   :  { %v2410_v16 = vor.u32 %v3111_v12, %v2407_v13  ;;  %621 = vmatpush.bf16.msra.mxu1 %v2470_v15 }
  0xd5   :  { %649 = vmatpush.bf16.msra.mxu3 %v2474_v20 }
  0xd6   :  { %635 = vmatpush.bf16.msra.mxu2 %v2410_v16 }
  0xd7   :  { %608 = vmatpush.bf16.msra.mxu0 %v2398_v25 }
  0xd8   :  { %622 = vmatpush.bf16.msra.mxu1 %v2462_v30 }
  0xd9   :  { %650 = vmatpush.bf16.msra.mxu3 %v2466_v35 }
  0xda   :  { %636 = vmatpush.bf16.msra.mxu2 %v2402_v31  ;;  %v382_v31 = vperm.slane %v379_v22, 1  ;;  %v3168_v22 = vld [vmem:[#allocation7 + $0x1f4] sm:$0xf0] }
  0xdb   :  { %609 = vmatpush.bf16.msra.mxu0 %v2390_v44 }
  0xdc   :  { %623 = vmatpush.bf16.msra.mxu1 %v2454_v45 }
  0xdd   :  { %651 = vmatpush.bf16.msra.mxu3 %v2458_v51 }
  0xde   :  { %637 = vmatpush.bf16.msra.mxu2 %v2394_v46 }
  0xdf   :  { %610 = vmatpush.bf16.msra.mxu0 %v2382_v55 }
  0xe0   :  { %624 = vmatpush.bf16.msra.mxu1 %v2446_v60 }
  0xe1   :  { %652 = vmatpush.bf16.msra.mxu3 %v2450_v1 }
  0xe2   :  { %638 = vmatpush.bf16.msra.mxu2 %v2386_v0 }
 0x13c   :  { %v320_v24 = vpop.xlane.xlu0 %319 }
 0x13d   :  { %v3656_v29 = vmul.f32 %v3653_v19, %v320_v24 }
 0x13e   :  { %v339_v34 = vpop.xlane.xlu1 %338 }
 0x13f   :  { %v343_v39 = vmul.f32 %v339_v34, %v3653_v19  ;;  %v345_v40 = vmul.f32 %v3656_v29, %v3656_v29  ;;  %v349_v23 = vsub.f32 %v3626_v61, %v3656_v29  ;;  %v350_v24 = vsub.f32 %v3628_v62, %v3656_v29 }
 0x140   :  { %v392_v34 = vperm.slane %v389_v28, 1  ;;  %v2632_v28 = vld [vmem:[#allocation7 + $0x1f8] sm:$0xf0] }
 0x141   :  { %v347_v50 = vsub.f32 %v343_v39, %v345_v40 }
 0x143   :  { %v353_v59 = vadd.f32 1e-05, %v347_v50 }
 0x144   :  { %v323_v63 = vpop.xlane.xlu0 %322 }
 0x145   :  { %3296 = vrsqrt.f32 %v353_v59  ;;  %v332_v2 = vmul.f32 %v3653_v19, %v323_v63  ;;  %vm361_vm3 = vweird.f32 %v353_v59 }
 0x146   :  { %v342_v3 = vpop.xlane.xlu1 %341 }
 0x147   :  { %v344_v4 = vmul.f32 %v342_v3, %v3653_v19  ;;  %v346_v5 = vmul.f32 %v332_v2, %v332_v2  ;;  %v351_v35 = vsub.f32 %v3636_v7, %v332_v2  ;;  %v352_v36 = vsub.f32 %v3638_v8, %v332_v2  ;;  %v437_v8 = vld [vmem:[%s3880_s7] ss:$8 sm:$0x3] }
 0x148   :  { %v439_v50 = vperm.slane %v437_v8, 0  ;;  %v440_v53 = vperm.slane %v437_v8, 1  ;;  %v2542_v8 = vld [vmem:[#allocation7 + $0x140] sm:$0xf] }
 0x149   :  { %v348_v6 = vsub.f32 %v344_v4, %v346_v5 }
 0x14b   :  { %v3297_v9 = vpop.eup %3296  ;;  %v354_v10 = vadd.f32 1e-05, %v348_v6 }
 0x14c   :  { %v356_v11 = vmul.f32 %v3297_v9, %v353_v59  ;;  %vm362_vm2 = vweird.f32 %v3297_v9 }
 0x14d   :  { %3298 = vrsqrt.f32 %v354_v10  ;;  %vm363_vm4 = vmor %vm361_vm3, %vm362_vm2  ;;  %vm371_vm6 = vweird.f32 %v354_v10 }
 0x14e   :  { %v357_v12 = vmul.f32 %v3297_v9, %v356_v11 }
 0x150   :  { %v358_v13 = vmul.f32 0.5, %v357_v12 }
 0x152   :  { %v359_v15 = vsub.f32 1.5, %v358_v13 }
 0x153   :  { %v3299_v16 = vpop.eup %3298 }
 0x154   :  { %v360_v17 = vmul.f32 %v3297_v9, %v359_v15  ;;  %v366_v18 = vmul.f32 %v3299_v16, %v354_v10  ;;  %vm372_vm5 = vweird.f32 %v3299_v16 }
 0x155   :  { %vm373_vm7 = vmor %vm371_vm6, %vm372_vm5 }
 0x156   :  { %v367_v20 = vmul.f32 %v3299_v16, %v366_v18  ;;  %v364_v21 = vsel %vm363_vm4, %v3297_v9, %v360_v17  ;;  %v2566_v17 = vld [vmem:[#allocation7 + $0x170] sm:$0xf]  ;;  %v3152_v18 = vld [vmem:[#allocation7 + $0x174] sm:$0xf0] }
 0x157   :  { %v375_v26 = vmul.f32 %v364_v21, %v349_v23  ;;  %v376_v30 = vmul.f32 %v364_v21, %v350_v24  ;;  %v2567_v21 = vor.u32 %v3152_v18, %v2566_v17  ;;  %v3151_v23 = vld [vmem:[#allocation7 + $0x174] sm:$0xf]  ;;  %v2568_v24 = vld [vmem:[#allocation7 + $0x178] sm:$0xf0]  ;;  %v2526_v18 = vld [vmem:[#allocation7 + $0x120] sm:$0xf] }
 0x158   :  { %v368_v25 = vmul.f32 0.5, %v367_v20  ;;  %v2630_v20 = vld [vmem:[#allocation7 + $0x1f0] sm:$0xf] }
 0x159   :  { %v385_v61 = vmul.f32 %v381_v27, %v375_v26  ;;  %v386_v37 = vmul.f32 %v382_v31, %v376_v30  ;;  %v2571_v26 = vor.u32 %v3151_v23, %v2568_v24  ;;  %941 = vmatpush.bf16.msrb.mxu0 %v2567_v21  ;;  %v2590_v21 = vld [vmem:[#allocation7 + $0x1a0] sm:$0xf]  ;;  %v3158_v24 = vld [vmem:[#allocation7 + $0x1a4] sm:$0xf0] }
 0x15a   :  { %v369_v14 = vsub.f32 1.5, %v368_v25  ;;  %v2631_v25 = vor.u32 %v3168_v22, %v2630_v20  ;;  %v3142_v20 = vld [vmem:[#allocation7 + $0x124] sm:$0xf0] }
 0x15b   :  { %v395_v40 = vadd.f32 %v391_v33, %v385_v61  ;;  %v396_v42 = vadd.f32 %v392_v34, %v386_v37  ;;  %969 = vmatpush.bf16.msrb.mxu2 %v2571_v26  ;;  %v2527_v23 = vor.u32 %v3142_v20, %v2526_v18  ;;  %v2528_v26 = vld [vmem:[#allocation7 + $0x128] sm:$0xf0]  ;;  %v714_v20 = vld [vmem:[#allocation8 + $0x1] ss:$8 sm:$0x3] }
 0x15c   :  { %v370_v32 = vmul.f32 %v3299_v16, %v369_v14  ;;  %955 = vmatpush.bf16.msrb.mxu1 %v2631_v25  ;;  %v3150_v14 = vld [vmem:[#allocation7 + $0x164] sm:$0xf0]  ;;  %v3141_v25 = vld [vmem:[#allocation7 + $0x124] sm:$0xf] }
 0x15d   :  { %v399_v45 = vmax.f32 %v395_v40, 0.0  ;;  %v400_v47 = vmax.f32 %v396_v42, 0.0  ;;  %v3148_v40 = vld [vmem:[#allocation7 + $0x154] sm:$0xf0] }
 0x15e   :  { %v374_v62 = vsel %vm373_vm7, %v3299_v16, %v370_v32  ;;  %v2622_v32 = vld [vmem:[#allocation7 + $0x1e0] sm:$0xf] }
 0x15f   :  { %v377_v29 = vmul.f32 %v374_v62, %v351_v35  ;;  %v378_v38 = vmul.f32 %v374_v62, %v352_v36  ;;  %v3149_v35 = vld [vmem:[#allocation7 + $0x164] sm:$0xf]  ;;  %v2560_v36 = vld [vmem:[#allocation7 + $0x168] sm:$0xf0] }
 0x160   :  { %v2563_v37 = vor.u32 %v3149_v35, %v2560_v36  ;;  %v3165_v62 = vld [vmem:[#allocation7 + $0x1e4] sm:$0xf]  ;;  %v3140_v35 = vld [vmem:[#allocation7 + $0x114] sm:$0xf0]  ;;  %v2582_v36 = vld [vmem:[#allocation7 + $0x190] sm:$0xf] }
 0x161   :  { %v387_v39 = vmul.f32 %v381_v27, %v377_v29  ;;  %v388_v41 = vmul.f32 %v382_v31, %v378_v38  ;;  %v3167_v27 = vld [vmem:[#allocation7 + $0x1f4] sm:$0xf]  ;;  %v2558_v31 = vld [vmem:[#allocation7 + $0x160] sm:$0xf]  ;;  %v2624_v29 = vld [vmem:[#allocation7 + $0x1e8] sm:$0xf0] }
 0x162   :  { %v2635_v30 = vor.u32 %v3167_v27, %v2632_v28  ;;  %v2627_v38 = vor.u32 %v3165_v62, %v2624_v29  ;;  %970 = vmatpush.bf16.msrb.mxu2 %v2563_v37  ;;  %v2591_v28 = vor.u32 %v3158_v24, %v2590_v21  ;;  %v3156_v62 = vld [vmem:[#allocation7 + $0x194] sm:$0xf0]  ;;  %v3139_v29 = vld [vmem:[#allocation7 + $0x114] sm:$0xf] }
 0x163   :  { %v397_v43 = vadd.f32 %v391_v33, %v387_v39  ;;  %v398_v44 = vadd.f32 %v392_v34, %v388_v41  ;;  %v2559_v33 = vor.u32 %v3150_v14, %v2558_v31  ;;  %v3166_v34 = vld [vmem:[#allocation7 + $0x1e4] sm:$0xf0]  ;;  %v2550_v39 = vld [vmem:[#allocation7 + $0x150] sm:$0xf]  ;;  %v3157_v31 = vld [vmem:[#allocation7 + $0x1a4] sm:$0xf] }
 0x164   :  { %983 = vmatpush.bf16.msrb.mxu3 %v2635_v30  ;;  %v2623_v61 = vor.u32 %v3166_v34, %v2622_v32  ;;  %v2614_v41 = vld [vmem:[#allocation7 + $0x1d0] sm:$0xf]  ;;  %v2551_v42 = vor.u32 %v3148_v40, %v2550_v39  ;;  %v2531_v30 = vor.u32 %v3141_v25, %v2528_v26  ;;  %v2592_v14 = vld [vmem:[#allocation7 + $0x1a8] sm:$0xf0]  ;;  %v2583_v40 = vor.u32 %v3156_v62, %v2582_v36 }
 0x165   :  { %v401_v46 = vmax.f32 %v397_v43, 0.0  ;;  %v402_v48 = vmax.f32 %v398_v44, 0.0  ;;  %942 = vmatpush.bf16.msrb.mxu0 %v2559_v33  ;;  %v3164_v43 = vld [vmem:[#allocation7 + $0x1d4] sm:$0xf0]  ;;  %v3147_v44 = vld [vmem:[#allocation7 + $0x154] sm:$0xf]  ;;  %v2595_v33 = vor.u32 %v3157_v31, %v2592_v14 }
 0x166   :  { %956 = vmatpush.bf16.msrb.mxu1 %v2623_v61  ;;  %v2518_v34 = vld [vmem:[#allocation7 + $0x110] sm:$0xf]  ;;  %v716_v25 = vperm.slane %v714_v20, 0 }
 0x167   :  { %v403_v49 = vpack.c.bf16 %v401_v46, %v399_v45  ;;  %v404_v7 = vpack.c.bf16 %v402_v48, %v400_v47  ;;  %v2552_v45 = vld [vmem:[#allocation7 + $0x158] sm:$0xf0]  ;;  %v2615_v46 = vor.u32 %v3164_v43, %v2614_v41  ;;  %v3163_v48 = vld [vmem:[#allocation7 + $0x1d4] sm:$0xf]  ;;  %v2519_v39 = vor.u32 %v3140_v35, %v2518_v34 }
 0x168   :  { %984 = vmatpush.bf16.msrb.mxu3 %v2627_v38  ;;  %v2555_v47 = vor.u32 %v3147_v44, %v2552_v45  ;;  %v2520_v38 = vld [vmem:[#allocation7 + $0x118] sm:$0xf0]  ;;  %v2510_v44 = vld [vmem:[#allocation7 + $0x100] sm:$0xf] }
 0x169   :  { %611 = vmatmul.bf16.vlgmr.msra.gmra.mxu0 %v403_v49  ;;  %625 = vmatmul.bf16.vlgmr.msra.gmra.mxu1 %v404_v7  ;;  %v2523_v41 = vor.u32 %v3139_v29, %v2520_v38  ;;  %v2584_v43 = vld [vmem:[#allocation7 + $0x198] sm:$0xf0]  ;;  %v725_v26 = vld [vmem:[#allocation10 + $0x1] ss:$8 sm:$0x3] }
 0x16a   :  { %639 = vmatmul.bf16.vlgmr.msra.gmra.mxu2 %v403_v49  ;;  %653 = vmatmul.bf16.vlgmr.msra.gmra.mxu3 %v404_v7  ;;  %v2616_v49 = vld [vmem:[#allocation7 + $0x1d8] sm:$0xf0] }
 0x16b   :  { %943 = vmatpush.bf16.msrb.mxu0 %v2551_v42  ;;  %v2619_v7 = vor.u32 %v3163_v48, %v2616_v49  ;;  %957 = vmatpush.bf16.msrb.mxu1 %v2615_v46  ;;  %v3155_v42 = vld [vmem:[#allocation7 + $0x194] sm:$0xf]  ;;  %v2574_v48 = vld [vmem:[#allocation7 + $0x180] sm:$0xf]  ;;  %v3154_v49 = vld [vmem:[#allocation7 + $0x184] sm:$0xf0] }
 0x16c   :  { %971 = vmatpush.bf16.msrb.mxu2 %v2555_v47  ;;  %v2587_v46 = vor.u32 %v3155_v42, %v2584_v43  ;;  %v3138_v47 = vld [vmem:[#allocation7 + $0x104] sm:$0xf0] }
 0x16d   :  { %985 = vmatpush.bf16.msrb.mxu3 %v2619_v7  ;;  %v2511_v7 = vor.u32 %v3138_v47, %v2510_v44 }
 0x1e6   :  { %v612_v51 = vpop.f32.mrf.mxu0  ;;  %v626_v54 = vpop.f32.mrf.mxu1 }
 0x1e7   :  { %v613_v52 = vadd.f32 %v612_v51, %v439_v50  ;;  %v2606_v51 = vld [vmem:[#allocation7 + $0x1c0] sm:$0xf] }
 0x1e9   :  { %v3672_v57 = vadd.f32 %v626_v54, %v613_v52  ;;  %v3145_v54 = vld [vmem:[#allocation7 + $0x144] sm:$0xf] }
 0x1eb   :  { %v667_v1 = vmul.f32 %v3672_v57, %v3672_v57 }
 0x1ed   :  { %v640_v55 = vpop.f32.mrf.mxu2  ;;  %v654_v56 = vpop.f32.mrf.mxu3 }
 0x1ee   :  { %v641_v58 = vadd.f32 %v640_v55, %v440_v53  ;;  %v614_v59 = vpop.f32.mrf.mxu0  ;;  %v628_v4 = vpop.f32.mrf.mxu1  ;;  %v2544_v55 = vld [vmem:[#allocation7 + $0x148] sm:$0xf0] }
 0x1ef   :  { %v615_v63 = vadd.f32 %v614_v59, %v439_v50  ;;  %v3146_v50 = vld [vmem:[#allocation7 + $0x144] sm:$0xf0]  ;;  %v3161_v59 = vld [vmem:[#allocation7 + $0x1c4] sm:$0xf] }
 0x1f0   :  { %v3674_v60 = vadd.f32 %v654_v56, %v641_v58  ;;  %v2543_v52 = vor.u32 %v3146_v50, %v2542_v8  ;;  %v2547_v58 = vor.u32 %v3145_v54, %v2544_v55  ;;  %v3137_v8 = vld [vmem:[#allocation7 + $0x104] sm:$0xf]  ;;  %v2512_v50 = vld [vmem:[#allocation7 + $0x108] sm:$0xf0] }
 0x1f1   :  { %v3682_v6 = vadd.f32 %v628_v4, %v615_v63  ;;  %v2608_v63 = vld [vmem:[#allocation7 + $0x1c8] sm:$0xf0] }
 0x1f2   :  { %v659_v0 = vadd.f32 %v3674_v60, %v3672_v57  ;;  %v668_v2 = vmul.f32 %v3674_v60, %v3674_v60  ;;  %944 = vmatpush.bf16.msrb.mxu0 %v2543_v52  ;;  %972 = vmatpush.bf16.msrb.mxu2 %v2547_v58  ;;  %v2576_v54 = vld [vmem:[#allocation7 + $0x188] sm:$0xf0] }
 0x1f3   :  { %v669_v13 = vmul.f32 %v3682_v6, %v3682_v6 }
 0x1f4   :  { %660 = vadd.xlane.f32.xlu2 %v659_v0  ;;  %v671_v3 = vadd.f32 %v668_v2, %v667_v1  ;;  %v2611_v0 = vor.u32 %v3161_v59, %v2608_v63  ;;  %v2534_v1 = vld [vmem:[#allocation7 + $0x130] sm:$0xf]  ;;  %v3144_v2 = vld [vmem:[#allocation7 + $0x134] sm:$0xf0] }
 0x1f5   :  { %v642_v5 = vpop.f32.mrf.mxu2  ;;  %v656_v10 = vpop.f32.mrf.mxu3  ;;  %v2535_v4 = vor.u32 %v3144_v2, %v2534_v1 }
 0x1f6   :  { %v643_v9 = vadd.f32 %v642_v5, %v440_v53  ;;  %672 = vadd.xlane.f32.xlu0 %v671_v3  ;;  %v3162_v53 = vld [vmem:[#allocation7 + $0x1c4] sm:$0xf0]  ;;  %v2598_v3 = vld [vmem:[#allocation7 + $0x1b0] sm:$0xf]  ;;  %986 = vmatpush.bf16.msrb.mxu3 %v2611_v0  ;;  %v3160_v5 = vld [vmem:[#allocation7 + $0x1b4] sm:$0xf0] }
 0x1f7   :  { %v2607_v56 = vor.u32 %v3162_v53, %v2606_v51  ;;  %945 = vmatpush.bf16.msrb.mxu0 %v2535_v4  ;;  %v3153_v51 = vld [vmem:[#allocation7 + $0x184] sm:$0xf]  ;;  %v2575_v53 = vor.u32 %v3154_v49, %v2574_v48 }
 0x1f8   :  { %v3684_v11 = vadd.f32 %v656_v10, %v643_v9  ;;  %v3143_v9 = vld [vmem:[#allocation7 + $0x134] sm:$0xf]  ;;  %v2536_v10 = vld [vmem:[#allocation7 + $0x138] sm:$0xf0]  ;;  %v2579_v58 = vor.u32 %v3153_v51, %v2576_v54 }
 0x1f9   :  { %958 = vmatpush.bf16.msrb.mxu1 %v2607_v56  ;;  %v2515_v56 = vor.u32 %v3137_v8, %v2512_v50 }
 0x1fa   :  { %v662_v12 = vadd.f32 %v3684_v11, %v3682_v6  ;;  %v670_v15 = vmul.f32 %v3684_v11, %v3684_v11 }
 0x1fb   :  { %946 = vmatpush.bf16.msrb.mxu0 %v2527_v23 }
 0x1fc   :  { %663 = vadd.xlane.f32.xlu2 %v662_v12  ;;  %v674_v16 = vadd.f32 %v670_v15, %v669_v13  ;;  %v2599_v12 = vor.u32 %v3160_v5, %v2598_v3  ;;  %v2539_v13 = vor.u32 %v3143_v9, %v2536_v10  ;;  %v3159_v15 = vld [vmem:[#allocation7 + $0x1b4] sm:$0xf] }
 0x1fe   :  { %675 = vadd.xlane.f32.xlu1 %v674_v16  ;;  %v2600_v16 = vld [vmem:[#allocation7 + $0x1b8] sm:$0xf0]  ;;  %959 = vmatpush.bf16.msrb.mxu1 %v2599_v12 }
 0x1ff   :  { %v2603_v17 = vor.u32 %v3159_v15, %v2600_v16  ;;  %973 = vmatpush.bf16.msrb.mxu2 %v2539_v13  ;;  %947 = vmatpush.bf16.msrb.mxu0 %v2519_v39 }
 0x201   :  { %987 = vmatpush.bf16.msrb.mxu3 %v2603_v17 }
 0x202   :  { %960 = vmatpush.bf16.msrb.mxu1 %v2591_v28 }
 0x203   :  { %974 = vmatpush.bf16.msrb.mxu2 %v2531_v30  ;;  %948 = vmatpush.bf16.msrb.mxu0 %v2511_v7  ;;  %v717_v30 = vperm.slane %v714_v20, 1  ;;  %v3200_v20 = vld [vmem:[#allocation7 + $0x2f4] sm:$0xf0] }
 0x205   :  { %988 = vmatpush.bf16.msrb.mxu3 %v2595_v33  ;;  %v728_v33 = vperm.slane %v725_v26, 1 }
 0x206   :  { %961 = vmatpush.bf16.msrb.mxu1 %v2583_v40 }
 0x207   :  { %975 = vmatpush.bf16.msrb.mxu2 %v2523_v41 }
 0x209   :  { %989 = vmatpush.bf16.msrb.mxu3 %v2587_v46 }
 0x20a   :  { %962 = vmatpush.bf16.msrb.mxu1 %v2575_v53 }
 0x20b   :  { %976 = vmatpush.bf16.msrb.mxu2 %v2515_v56 }
 0x20d   :  { %990 = vmatpush.bf16.msrb.mxu3 %v2579_v58 }
 0x267   :  { %v661_v22 = vpop.xlane.xlu2 %660 }
 0x268   :  { %v3693_v27 = vmul.f32 %v661_v22, %v3653_v19 }
 0x269   :  { %v673_v32 = vpop.xlane.xlu0 %672 }
 0x26a   :  { %v677_v61 = vmul.f32 %v673_v32, %v3653_v19  ;;  %v679_v37 = vmul.f32 %v3693_v27, %v3693_v27  ;;  %v683_v21 = vsub.f32 %v3672_v57, %v3693_v27  ;;  %v684_v22 = vsub.f32 %v3674_v60, %v3693_v27 }
 0x26b   :  { %v727_v32 = vperm.slane %v725_v26, 0  ;;  %v2761_v26 = vld [vmem:[#allocation7 + $0x2f8] sm:$0xf0] }
 0x26c   :  { %v681_v45 = vsub.f32 %v677_v61, %v679_v37 }
 0x26e   :  { %v687_v52 = vadd.f32 1e-05, %v681_v45 }
 0x26f   :  { %v664_v55 = vpop.xlane.xlu2 %663 }
 0x270   :  { %3300 = vrsqrt.f32 %v687_v52  ;;  %v666_v59 = vmul.f32 %v664_v55, %v3653_v19  ;;  %vm695_vm9 = vweird.f32 %v687_v52 }
 0x271   :  { %v676_v63 = vpop.xlane.xlu1 %675 }
 0x272   :  { %v678_v0 = vmul.f32 %v676_v63, %v3653_v19  ;;  %v680_v1 = vmul.f32 %v666_v59, %v666_v59  ;;  %v685_v34 = vsub.f32 %v3682_v6, %v666_v59  ;;  %v686_v35 = vsub.f32 %v3684_v11, %v666_v59  ;;  %v2507_v11 = vld [vmem:[%s3880_s7 + $0x1] ss:$8 sm:$0x3] }
 0x273   :  { %v777_v46 = vperm.slane %v2507_v11, 0  ;;  %v778_v49 = vperm.slane %v2507_v11, 1  ;;  %v2671_v11 = vld [vmem:[#allocation7 + $0x240] sm:$0xf] }
 0x274   :  { %v682_v2 = vsub.f32 %v678_v0, %v680_v1 }
 0x276   :  { %v3301_v3 = vpop.eup %3300  ;;  %v688_v4 = vadd.f32 1e-05, %v682_v2 }
 0x277   :  { %v690_v5 = vmul.f32 %v3301_v3, %v687_v52  ;;  %vm696_vm8 = vweird.f32 %v3301_v3 }
 0x278   :  { %3302 = vrsqrt.f32 %v688_v4  ;;  %vm697_vm10 = vmor %vm695_vm9, %vm696_vm8  ;;  %vm705_vm12 = vweird.f32 %v688_v4 }
 0x279   :  { %v691_v9 = vmul.f32 %v3301_v3, %v690_v5 }
 0x27b   :  { %v692_v10 = vmul.f32 0.5, %v691_v9 }
 0x27d   :  { %v693_v12 = vsub.f32 1.5, %v692_v10 }
 0x27e   :  { %v3303_v13 = vpop.eup %3302 }
 0x27f   :  { %v694_v15 = vmul.f32 %v3301_v3, %v693_v12  ;;  %v700_v16 = vmul.f32 %v3303_v13, %v688_v4  ;;  %vm706_vm11 = vweird.f32 %v3303_v13 }
 0x280   :  { %vm707_vm13 = vmor %vm705_vm12, %vm706_vm11 }
 0x281   :  { %v698_v17 = vsel %vm697_vm10, %v3301_v3, %v694_v15  ;;  %v701_v18 = vmul.f32 %v3303_v13, %v700_v16  ;;  %v2695_v15 = vld [vmem:[#allocation7 + $0x270] sm:$0xf]  ;;  %v3184_v16 = vld [vmem:[#allocation7 + $0x274] sm:$0xf0] }
 0x282   :  { %v709_v24 = vmul.f32 %v698_v17, %v683_v21  ;;  %v710_v28 = vmul.f32 %v698_v17, %v684_v22  ;;  %v2759_v17 = vld [vmem:[#allocation7 + $0x2f0] sm:$0xf]  ;;  %v3183_v21 = vld [vmem:[#allocation7 + $0x274] sm:$0xf]  ;;  %v2697_v22 = vld [vmem:[#allocation7 + $0x278] sm:$0xf0] }
 0x283   :  { %v702_v23 = vmul.f32 0.5, %v701_v18  ;;  %v2696_v18 = vor.u32 %v3184_v16, %v2695_v15  ;;  %v2655_v16 = vld [vmem:[#allocation7 + $0x220] sm:$0xf] }
 0x284   :  { %v720_v57 = vmul.f32 %v716_v25, %v709_v24  ;;  %v721_v36 = vmul.f32 %v717_v30, %v710_v28  ;;  %v2700_v24 = vor.u32 %v3183_v21, %v2697_v22  ;;  %v3190_v22 = vld [vmem:[#allocation7 + $0x2a4] sm:$0xf0] }
 0x285   :  { %v703_v31 = vsub.f32 1.5, %v702_v23  ;;  %v2760_v23 = vor.u32 %v3200_v20, %v2759_v17  ;;  %1279 = vmatpush.bf16.msra.mxu0 %v2696_v18  ;;  %v3174_v17 = vld [vmem:[#allocation7 + $0x224] sm:$0xf0]  ;;  %v2719_v18 = vld [vmem:[#allocation7 + $0x2a0] sm:$0xf] }
 0x286   :  { %v731_v62 = vadd.f32 %v727_v32, %v720_v57  ;;  %v732_v38 = vadd.f32 %v728_v33, %v721_v36  ;;  %1307 = vmatpush.bf16.msra.mxu2 %v2700_v24  ;;  %v2656_v21 = vor.u32 %v3174_v17, %v2655_v16  ;;  %v2657_v24 = vld [vmem:[#allocation7 + $0x228] sm:$0xf0]  ;;  %v1052_v17 = vld [vmem:[#allocation8 + $0x2] ss:$8 sm:$0x3] }
 0x287   :  { %v704_v14 = vmul.f32 %v3303_v13, %v703_v31  ;;  %1293 = vmatpush.bf16.msra.mxu1 %v2760_v23  ;;  %v3182_v31 = vld [vmem:[#allocation7 + $0x264] sm:$0xf0]  ;;  %v3173_v23 = vld [vmem:[#allocation7 + $0x224] sm:$0xf] }
 0x288   :  { %v735_v41 = vmax.f32 %v731_v62, 0.0  ;;  %v736_v43 = vmax.f32 %v732_v38, 0.0  ;;  %v3180_v62 = vld [vmem:[#allocation7 + $0x254] sm:$0xf0] }
 0x289   :  { %v708_v60 = vsel %vm707_vm13, %v3303_v13, %v704_v14  ;;  %v2751_v14 = vld [vmem:[#allocation7 + $0x2e0] sm:$0xf] }
 0x28a   :  { %v711_v27 = vmul.f32 %v708_v60, %v685_v34  ;;  %v712_v61 = vmul.f32 %v708_v60, %v686_v35  ;;  %v3181_v34 = vld [vmem:[#allocation7 + $0x264] sm:$0xf]  ;;  %v2689_v35 = vld [vmem:[#allocation7 + $0x268] sm:$0xf0] }
 0x28b   :  { %v2692_v36 = vor.u32 %v3181_v34, %v2689_v35  ;;  %v3197_v60 = vld [vmem:[#allocation7 + $0x2e4] sm:$0xf]  ;;  %v2647_v35 = vld [vmem:[#allocation7 + $0x210] sm:$0xf] }
 0x28c   :  { %v722_v37 = vmul.f32 %v716_v25, %v711_v27  ;;  %v723_v29 = vmul.f32 %v717_v30, %v712_v61  ;;  %v3199_v25 = vld [vmem:[#allocation7 + $0x2f4] sm:$0xf]  ;;  %v2687_v30 = vld [vmem:[#allocation7 + $0x260] sm:$0xf]  ;;  %v2753_v27 = vld [vmem:[#allocation7 + $0x2e8] sm:$0xf0] }
 0x28d   :  { %v2764_v28 = vor.u32 %v3199_v25, %v2761_v26  ;;  %v2756_v61 = vor.u32 %v3197_v60, %v2753_v27  ;;  %1308 = vmatpush.bf16.msra.mxu2 %v2692_v36  ;;  %v2720_v26 = vor.u32 %v3190_v22, %v2719_v18  ;;  %v2711_v36 = vld [vmem:[#allocation7 + $0x290] sm:$0xf]  ;;  %v3188_v27 = vld [vmem:[#allocation7 + $0x294] sm:$0xf0] }
 0x28e   :  { %v733_v39 = vadd.f32 %v727_v32, %v722_v37  ;;  %v734_v40 = vadd.f32 %v728_v33, %v723_v29  ;;  %v2688_v32 = vor.u32 %v3182_v31, %v2687_v30  ;;  %v3198_v33 = vld [vmem:[#allocation7 + $0x2e4] sm:$0xf0]  ;;  %v2679_v37 = vld [vmem:[#allocation7 + $0x250] sm:$0xf]  ;;  %v3189_v30 = vld [vmem:[#allocation7 + $0x2a4] sm:$0xf] }
 0x28f   :  { %1321 = vmatpush.bf16.msra.mxu3 %v2764_v28  ;;  %v2752_v57 = vor.u32 %v3198_v33, %v2751_v14  ;;  %v2743_v29 = vld [vmem:[#allocation7 + $0x2d0] sm:$0xf]  ;;  %v2680_v38 = vor.u32 %v3180_v62, %v2679_v37  ;;  %v2660_v28 = vor.u32 %v3173_v23, %v2657_v24  ;;  %v2721_v31 = vld [vmem:[#allocation7 + $0x2a8] sm:$0xf0]  ;;  %v2649_v37 = vld [vmem:[#allocation7 + $0x218] sm:$0xf0] }
 0x290   :  { %v737_v42 = vmax.f32 %v733_v39, 0.0  ;;  %v738_v44 = vmax.f32 %v734_v40, 0.0  ;;  %1280 = vmatpush.bf16.msra.mxu0 %v2688_v32  ;;  %v3196_v39 = vld [vmem:[#allocation7 + $0x2d4] sm:$0xf0]  ;;  %v3179_v40 = vld [vmem:[#allocation7 + $0x254] sm:$0xf]  ;;  %v2724_v32 = vor.u32 %v3189_v30, %v2721_v31 }
 0x291   :  { %1294 = vmatpush.bf16.msra.mxu1 %v2752_v57  ;;  %v3172_v57 = vld [vmem:[#allocation7 + $0x214] sm:$0xf0]  ;;  %v1054_v24 = vperm.slane %v1052_v17, 0 }
 0x292   :  { %v739_v45 = vpack.c.bf16 %v737_v42, %v735_v41  ;;  %v740_v6 = vpack.c.bf16 %v738_v44, %v736_v43  ;;  %v2681_v41 = vld [vmem:[#allocation7 + $0x258] sm:$0xf0]  ;;  %v2744_v42 = vor.u32 %v3196_v39, %v2743_v29  ;;  %v3195_v44 = vld [vmem:[#allocation7 + $0x2d4] sm:$0xf]  ;;  %v2648_v60 = vor.u32 %v3172_v57, %v2647_v35 }
 0x293   :  { %1322 = vmatpush.bf16.msra.mxu3 %v2756_v61  ;;  %v2684_v43 = vor.u32 %v3179_v40, %v2681_v41  ;;  %v3171_v61 = vld [vmem:[#allocation7 + $0x214] sm:$0xf]  ;;  %v2712_v29 = vor.u32 %v3188_v27, %v2711_v36  ;;  %v2713_v40 = vld [vmem:[#allocation7 + $0x298] sm:$0xf0]  ;;  %v2639_v41 = vld [vmem:[#allocation7 + $0x200] sm:$0xf] }
 0x294   :  { %949 = vmatmul.bf16.vlgmr.msrb.gmra.mxu0 %v739_v45  ;;  %963 = vmatmul.bf16.vlgmr.msrb.gmra.mxu1 %v740_v6  ;;  %v3187_v39 = vld [vmem:[#allocation7 + $0x294] sm:$0xf] }
 0x295   :  { %977 = vmatmul.bf16.vlgmr.msrb.gmra.mxu2 %v739_v45  ;;  %991 = vmatmul.bf16.vlgmr.msrb.gmra.mxu3 %v740_v6  ;;  %v2745_v45 = vld [vmem:[#allocation7 + $0x2d8] sm:$0xf0] }
 0x296   :  { %1281 = vmatpush.bf16.msra.mxu0 %v2680_v38  ;;  %v2748_v6 = vor.u32 %v3195_v44, %v2745_v45  ;;  %1295 = vmatpush.bf16.msra.mxu1 %v2744_v42  ;;  %v2652_v38 = vor.u32 %v3171_v61, %v2649_v37  ;;  %v2716_v42 = vor.u32 %v3187_v39, %v2713_v40  ;;  %v2703_v44 = vld [vmem:[#allocation7 + $0x280] sm:$0xf]  ;;  %v3186_v45 = vld [vmem:[#allocation7 + $0x284] sm:$0xf0] }
 0x297   :  { %1309 = vmatpush.bf16.msra.mxu2 %v2684_v43  ;;  %v3170_v43 = vld [vmem:[#allocation7 + $0x204] sm:$0xf0] }
 0x298   :  { %1323 = vmatpush.bf16.msra.mxu3 %v2748_v6 }
 0x311   :  { %v950_v47 = vpop.f32.mrf.mxu0  ;;  %v964_v7 = vpop.f32.mrf.mxu1 }
 0x312   :  { %v951_v48 = vadd.f32 %v950_v47, %v777_v46  ;;  %v2735_v47 = vld [vmem:[#allocation7 + $0x2c0] sm:$0xf] }
 0x314   :  { %v3709_v51 = vadd.f32 %v964_v7, %v951_v48  ;;  %v3177_v7 = vld [vmem:[#allocation7 + $0x244] sm:$0xf] }
 0x316   :  { %v1005_v58 = vmul.f32 %v3709_v51, %v3709_v51 }
 0x318   :  { %v978_v8 = vpop.f32.mrf.mxu2  ;;  %v992_v50 = vpop.f32.mrf.mxu3 }
 0x319   :  { %v979_v52 = vadd.f32 %v978_v8, %v778_v49  ;;  %v952_v53 = vpop.f32.mrf.mxu0  ;;  %v966_v0 = vpop.f32.mrf.mxu1  ;;  %v2673_v8 = vld [vmem:[#allocation7 + $0x248] sm:$0xf0] }
 0x31a   :  { %v953_v55 = vadd.f32 %v952_v53, %v777_v46  ;;  %v3178_v46 = vld [vmem:[#allocation7 + $0x244] sm:$0xf0]  ;;  %v3193_v53 = vld [vmem:[#allocation7 + $0x2c4] sm:$0xf] }
 0x31b   :  { %v3711_v54 = vadd.f32 %v992_v50, %v979_v52  ;;  %v2672_v48 = vor.u32 %v3178_v46, %v2671_v11  ;;  %v2676_v52 = vor.u32 %v3177_v7, %v2673_v8  ;;  %v2640_v11 = vor.u32 %v3170_v43, %v2639_v41  ;;  %v3185_v8 = vld [vmem:[#allocation7 + $0x284] sm:$0xf] }
 0x31c   :  { %v3719_v2 = vadd.f32 %v966_v0, %v953_v55  ;;  %v2737_v55 = vld [vmem:[#allocation7 + $0x2c8] sm:$0xf0]  ;;  %v2704_v46 = vor.u32 %v3186_v45, %v2703_v44 }
 0x31d   :  { %v997_v56 = vadd.f32 %v3711_v54, %v3709_v51  ;;  %v1006_v59 = vmul.f32 %v3711_v54, %v3711_v54  ;;  %1282 = vmatpush.bf16.msra.mxu0 %v2672_v48  ;;  %1310 = vmatpush.bf16.msra.mxu2 %v2676_v52  ;;  %v2641_v48 = vld [vmem:[#allocation7 + $0x208] sm:$0xf0] }
 0x31e   :  { %v1007_v10 = vmul.f32 %v3719_v2, %v3719_v2 }
 0x31f   :  { %998 = vadd.xlane.f32.xlu2 %v997_v56  ;;  %v1009_v63 = vadd.f32 %v1006_v59, %v1005_v58  ;;  %v2740_v56 = vor.u32 %v3193_v53, %v2737_v55  ;;  %v2663_v58 = vld [vmem:[#allocation7 + $0x230] sm:$0xf]  ;;  %v3176_v59 = vld [vmem:[#allocation7 + $0x234] sm:$0xf0] }
 0x320   :  { %v980_v1 = vpop.f32.mrf.mxu2  ;;  %v994_v4 = vpop.f32.mrf.mxu3  ;;  %v2664_v0 = vor.u32 %v3176_v59, %v2663_v58 }
 0x321   :  { %v981_v3 = vadd.f32 %v980_v1, %v778_v49  ;;  %1010 = vadd.xlane.f32.xlu1 %v1009_v63  ;;  %v3194_v49 = vld [vmem:[#allocation7 + $0x2c4] sm:$0xf0]  ;;  %v2727_v63 = vld [vmem:[#allocation7 + $0x2b0] sm:$0xf]  ;;  %1324 = vmatpush.bf16.msra.mxu3 %v2740_v56  ;;  %v3192_v1 = vld [vmem:[#allocation7 + $0x2b4] sm:$0xf0] }
 0x322   :  { %v2736_v50 = vor.u32 %v3194_v49, %v2735_v47  ;;  %1283 = vmatpush.bf16.msra.mxu0 %v2664_v0  ;;  %v3169_v47 = vld [vmem:[#allocation7 + $0x204] sm:$0xf] }
 0x323   :  { %v3721_v5 = vadd.f32 %v994_v4, %v981_v3  ;;  %v3175_v3 = vld [vmem:[#allocation7 + $0x234] sm:$0xf]  ;;  %v2665_v4 = vld [vmem:[#allocation7 + $0x238] sm:$0xf0]  ;;  %v2644_v7 = vor.u32 %v3169_v47, %v2641_v48 }
 0x324   :  { %1296 = vmatpush.bf16.msra.mxu1 %v2736_v50  ;;  %v2705_v50 = vld [vmem:[#allocation7 + $0x288] sm:$0xf0] }
 0x325   :  { %v1000_v9 = vadd.f32 %v3721_v5, %v3719_v2  ;;  %v1008_v12 = vmul.f32 %v3721_v5, %v3721_v5  ;;  %v2708_v53 = vor.u32 %v3185_v8, %v2705_v50 }
 0x326   :  { %1284 = vmatpush.bf16.msra.mxu0 %v2656_v21 }
 0x327   :  { %1001 = vadd.xlane.f32.xlu0 %v1000_v9  ;;  %v1012_v13 = vadd.f32 %v1008_v12, %v1007_v10  ;;  %v2728_v9 = vor.u32 %v3192_v1, %v2727_v63  ;;  %v2668_v10 = vor.u32 %v3175_v3, %v2665_v4  ;;  %v3191_v12 = vld [vmem:[#allocation7 + $0x2b4] sm:$0xf] }
 0x329   :  { %1013 = vadd.xlane.f32.xlu2 %v1012_v13  ;;  %v2729_v13 = vld [vmem:[#allocation7 + $0x2b8] sm:$0xf0]  ;;  %1297 = vmatpush.bf16.msra.mxu1 %v2728_v9 }
 0x32a   :  { %v2732_v15 = vor.u32 %v3191_v12, %v2729_v13  ;;  %1311 = vmatpush.bf16.msra.mxu2 %v2668_v10  ;;  %1285 = vmatpush.bf16.msra.mxu0 %v2648_v60 }
 0x32c   :  { %1325 = vmatpush.bf16.msra.mxu3 %v2732_v15 }
 0x32d   :  { %1298 = vmatpush.bf16.msra.mxu1 %v2720_v26  ;;  %v1063_v26 = vld [vmem:[#allocation10 + $0x2] ss:$8 sm:$0x3] }
 0x32e   :  { %1312 = vmatpush.bf16.msra.mxu2 %v2660_v28  ;;  %1286 = vmatpush.bf16.msra.mxu0 %v2640_v11  ;;  %v1055_v28 = vperm.slane %v1052_v17, 1  ;;  %v3232_v17 = vld [vmem:[#allocation7 + $0x3f4] sm:$0xf0] }
 0x330   :  { %1326 = vmatpush.bf16.msra.mxu3 %v2724_v32  ;;  %v1066_v32 = vperm.slane %v1063_v26, 1 }
 0x331   :  { %1299 = vmatpush.bf16.msra.mxu1 %v2712_v29 }
 0x332   :  { %1313 = vmatpush.bf16.msra.mxu2 %v2652_v38 }
 0x334   :  { %1327 = vmatpush.bf16.msra.mxu3 %v2716_v42 }
 0x335   :  { %1300 = vmatpush.bf16.msra.mxu1 %v2704_v46 }
 0x336   :  { %1314 = vmatpush.bf16.msra.mxu2 %v2644_v7 }
 0x338   :  { %1328 = vmatpush.bf16.msra.mxu3 %v2708_v53 }
 0x392   :  { %v999_v20 = vpop.xlane.xlu2 %998 }
 0x393   :  { %v3730_v25 = vmul.f32 %v999_v20, %v3653_v19 }
 0x394   :  { %v1011_v14 = vpop.xlane.xlu1 %1010 }
 0x395   :  { %v1015_v33 = vmul.f32 %v1011_v14, %v3653_v19  ;;  %v1017_v34 = vmul.f32 %v3730_v25, %v3730_v25  ;;  %v1021_v18 = vsub.f32 %v3709_v51, %v3730_v25  ;;  %v1022_v20 = vsub.f32 %v3711_v54, %v3730_v25 }
 0x396   :  { %v1065_v14 = vperm.slane %v1063_v26, 0 }
 0x397   :  { %v1019_v62 = vsub.f32 %v1015_v33, %v1017_v34 }
 0x399   :  { %v1025_v6 = vadd.f32 1e-05, %v1019_v62 }
 0x39a   :  { %v1002_v49 = vpop.xlane.xlu0 %1001 }
 0x39b   :  { %3304 = vrsqrt.f32 %v1025_v6  ;;  %v1004_v52 = vmul.f32 %v1002_v49, %v3653_v19  ;;  %vm1033_vm15 = vweird.f32 %v1025_v6 }
 0x39c   :  { %v1014_v55 = vpop.xlane.xlu2 %1013 }
 0x39d   :  { %v1018_v56 = vmul.f32 %v1004_v52, %v1004_v52  ;;  %v1016_v58 = vmul.f32 %v1014_v55, %v3653_v19  ;;  %v1023_v33 = vsub.f32 %v3719_v2, %v1004_v52  ;;  %v1024_v34 = vsub.f32 %v3721_v5, %v1004_v52  ;;  %v2636_v5 = vld [vmem:[%s3880_s7 + $0x2] ss:$8 sm:$0x3] }
 0x39e   :  { %v1115_v42 = vperm.slane %v2636_v5, 0  ;;  %v1116_v45 = vperm.slane %v2636_v5, 1  ;;  %v2800_v5 = vld [vmem:[#allocation7 + $0x340] sm:$0xf] }
 0x39f   :  { %v1020_v59 = vsub.f32 %v1016_v58, %v1018_v56 }
 0x3a1   :  { %v3305_v63 = vpop.eup %3304  ;;  %v1026_v0 = vadd.f32 1e-05, %v1020_v59 }
 0x3a2   :  { %v1028_v1 = vmul.f32 %v3305_v63, %v1025_v6  ;;  %vm1034_vm14 = vweird.f32 %v3305_v63 }
 0x3a3   :  { %3306 = vrsqrt.f32 %v1026_v0  ;;  %vm1035_vm1 = vmor %vm1033_vm15, %vm1034_vm14  ;;  %vm1043_vm3 = vweird.f32 %v1026_v0 }
 0x3a4   :  { %v1029_v3 = vmul.f32 %v3305_v63, %v1028_v1 }
 0x3a6   :  { %v1030_v4 = vmul.f32 0.5, %v1029_v3 }
 0x3a8   :  { %v1031_v9 = vsub.f32 1.5, %v1030_v4 }
 0x3a9   :  { %v3307_v10 = vpop.eup %3306 }
 0x3aa   :  { %v1032_v12 = vmul.f32 %v3305_v63, %v1031_v9  ;;  %v1038_v13 = vmul.f32 %v3307_v10, %v1026_v0  ;;  %vm1044_vm2 = vweird.f32 %v3307_v10 }
 0x3ab   :  { %vm1045_vm4 = vmor %vm1043_vm3, %vm1044_vm2 }
 0x3ac   :  { %v1036_v15 = vsel %vm1035_vm1, %v3305_v63, %v1032_v12  ;;  %v1039_v16 = vmul.f32 %v3307_v10, %v1038_v13  ;;  %v2824_v12 = vld [vmem:[#allocation7 + $0x370] sm:$0xf]  ;;  %v3216_v13 = vld [vmem:[#allocation7 + $0x374] sm:$0xf0] }
 0x3ad   :  { %v1047_v22 = vmul.f32 %v1036_v15, %v1021_v18  ;;  %v1048_v23 = vmul.f32 %v1036_v15, %v1022_v20  ;;  %v2888_v15 = vld [vmem:[#allocation7 + $0x3f0] sm:$0xf]  ;;  %v3215_v18 = vld [vmem:[#allocation7 + $0x374] sm:$0xf]  ;;  %v2826_v20 = vld [vmem:[#allocation7 + $0x378] sm:$0xf0] }
 0x3ae   :  { %v1040_v21 = vmul.f32 0.5, %v1039_v16  ;;  %v2825_v16 = vor.u32 %v3216_v13, %v2824_v12  ;;  %v2784_v13 = vld [vmem:[#allocation7 + $0x320] sm:$0xf] }
 0x3af   :  { %v1058_v51 = vmul.f32 %v1054_v24, %v1047_v22  ;;  %v1059_v35 = vmul.f32 %v1055_v28, %v1048_v23  ;;  %v2829_v22 = vor.u32 %v3215_v18, %v2826_v20  ;;  %v3231_v23 = vld [vmem:[#allocation7 + $0x3f4] sm:$0xf]  ;;  %v3222_v20 = vld [vmem:[#allocation7 + $0x3a4] sm:$0xf0] }
 0x3b0   :  { %v1041_v30 = vsub.f32 1.5, %v1040_v21  ;;  %v2889_v21 = vor.u32 %v3232_v17, %v2888_v15  ;;  %1617 = vmatpush.bf16.msrb.mxu0 %v2825_v16  ;;  %v3206_v15 = vld [vmem:[#allocation7 + $0x324] sm:$0xf0]  ;;  %v2848_v16 = vld [vmem:[#allocation7 + $0x3a0] sm:$0xf] }
 0x3b1   :  { %v1069_v60 = vadd.f32 %v1065_v14, %v1058_v51  ;;  %v1070_v61 = vadd.f32 %v1066_v32, %v1059_v35  ;;  %1645 = vmatpush.bf16.msrb.mxu2 %v2829_v22  ;;  %v2785_v18 = vor.u32 %v3206_v15, %v2784_v13  ;;  %v2786_v22 = vld [vmem:[#allocation7 + $0x328] sm:$0xf0]  ;;  %v1390_v15 = vld [vmem:[#allocation8 + $0x3] ss:$8 sm:$0x3] }
 0x3b2   :  { %v1042_v31 = vmul.f32 %v3307_v10, %v1041_v30  ;;  %1631 = vmatpush.bf16.msrb.mxu1 %v2889_v21  ;;  %v3214_v30 = vld [vmem:[#allocation7 + $0x364] sm:$0xf0]  ;;  %v3205_v21 = vld [vmem:[#allocation7 + $0x324] sm:$0xf] }
 0x3b3   :  { %v1073_v29 = vmax.f32 %v1069_v60, 0.0  ;;  %v1074_v39 = vmax.f32 %v1070_v61, 0.0  ;;  %v3212_v60 = vld [vmem:[#allocation7 + $0x354] sm:$0xf0] }
 0x3b4   :  { %v1046_v54 = vsel %vm1045_vm4, %v3307_v10, %v1042_v31  ;;  %v2880_v31 = vld [vmem:[#allocation7 + $0x3e0] sm:$0xf] }
 0x3b5   :  { %v1049_v25 = vmul.f32 %v1046_v54, %v1023_v33  ;;  %v1050_v57 = vmul.f32 %v1046_v54, %v1024_v34  ;;  %v3213_v33 = vld [vmem:[#allocation7 + $0x364] sm:$0xf]  ;;  %v2818_v34 = vld [vmem:[#allocation7 + $0x368] sm:$0xf0] }
 0x3b6   :  { %v2821_v35 = vor.u32 %v3213_v33, %v2818_v34  ;;  %v3229_v54 = vld [vmem:[#allocation7 + $0x3e4] sm:$0xf]  ;;  %v2776_v34 = vld [vmem:[#allocation7 + $0x310] sm:$0xf] }
 0x3b7   :  { %v1060_v36 = vmul.f32 %v1054_v24, %v1049_v25  ;;  %v1061_v27 = vmul.f32 %v1055_v28, %v1050_v57  ;;  %v2890_v24 = vld [vmem:[#allocation7 + $0x3f8] sm:$0xf0]  ;;  %v2816_v28 = vld [vmem:[#allocation7 + $0x360] sm:$0xf]  ;;  %v2882_v25 = vld [vmem:[#allocation7 + $0x3e8] sm:$0xf0] }
 0x3b8   :  { %v2893_v26 = vor.u32 %v3231_v23, %v2890_v24  ;;  %v2885_v57 = vor.u32 %v3229_v54, %v2882_v25  ;;  %1646 = vmatpush.bf16.msrb.mxu2 %v2821_v35  ;;  %v2849_v24 = vor.u32 %v3222_v20, %v2848_v16  ;;  %v2840_v35 = vld [vmem:[#allocation7 + $0x390] sm:$0xf]  ;;  %v3220_v25 = vld [vmem:[#allocation7 + $0x394] sm:$0xf0] }
 0x3b9   :  { %v1071_v37 = vadd.f32 %v1065_v14, %v1060_v36  ;;  %v1072_v62 = vadd.f32 %v1066_v32, %v1061_v27  ;;  %v2817_v14 = vor.u32 %v3214_v30, %v2816_v28  ;;  %v3230_v32 = vld [vmem:[#allocation7 + $0x3e4] sm:$0xf0]  ;;  %v2808_v36 = vld [vmem:[#allocation7 + $0x350] sm:$0xf]  ;;  %v3221_v28 = vld [vmem:[#allocation7 + $0x3a4] sm:$0xf] }
 0x3ba   :  { %1659 = vmatpush.bf16.msrb.mxu3 %v2893_v26  ;;  %v2881_v51 = vor.u32 %v3230_v32, %v2880_v31  ;;  %v2872_v27 = vld [vmem:[#allocation7 + $0x3d0] sm:$0xf]  ;;  %v2809_v61 = vor.u32 %v3212_v60, %v2808_v36  ;;  %v2789_v26 = vor.u32 %v3205_v21, %v2786_v22  ;;  %v2850_v30 = vld [vmem:[#allocation7 + $0x3a8] sm:$0xf0]  ;;  %v2778_v36 = vld [vmem:[#allocation7 + $0x318] sm:$0xf0] }
 0x3bb   :  { %v1075_v38 = vmax.f32 %v1071_v37, 0.0  ;;  %v1076_v40 = vmax.f32 %v1072_v62, 0.0  ;;  %1618 = vmatpush.bf16.msrb.mxu0 %v2817_v14  ;;  %v3228_v37 = vld [vmem:[#allocation7 + $0x3d4] sm:$0xf0]  ;;  %v3211_v62 = vld [vmem:[#allocation7 + $0x354] sm:$0xf]  ;;  %v2853_v14 = vor.u32 %v3221_v28, %v2850_v30 }
 0x3bc   :  { %1632 = vmatpush.bf16.msrb.mxu1 %v2881_v51  ;;  %v3204_v51 = vld [vmem:[#allocation7 + $0x314] sm:$0xf0]  ;;  %v1392_v22 = vperm.slane %v1390_v15, 0 }
 0x3bd   :  { %v1077_v41 = vpack.c.bf16 %v1075_v38, %v1073_v29  ;;  %v1078_v2 = vpack.c.bf16 %v1076_v40, %v1074_v39  ;;  %v2810_v29 = vld [vmem:[#allocation7 + $0x358] sm:$0xf0]  ;;  %v2873_v38 = vor.u32 %v3228_v37, %v2872_v27  ;;  %v3227_v40 = vld [vmem:[#allocation7 + $0x3d4] sm:$0xf]  ;;  %v2777_v54 = vor.u32 %v3204_v51, %v2776_v34 }
 0x3be   :  { %1660 = vmatpush.bf16.msrb.mxu3 %v2885_v57  ;;  %v2813_v39 = vor.u32 %v3211_v62, %v2810_v29  ;;  %v3203_v57 = vld [vmem:[#allocation7 + $0x314] sm:$0xf]  ;;  %v2841_v27 = vor.u32 %v3220_v25, %v2840_v35  ;;  %v2842_v62 = vld [vmem:[#allocation7 + $0x398] sm:$0xf0]  ;;  %v2768_v29 = vld [vmem:[#allocation7 + $0x300] sm:$0xf] }
 0x3bf   :  { %1287 = vmatmul.bf16.vlgmr.msra.gmra.mxu0 %v1077_v41  ;;  %1301 = vmatmul.bf16.vlgmr.msra.gmra.mxu1 %v1078_v2  ;;  %v3219_v37 = vld [vmem:[#allocation7 + $0x394] sm:$0xf] }
 0x3c0   :  { %1315 = vmatmul.bf16.vlgmr.msra.gmra.mxu2 %v1077_v41  ;;  %1329 = vmatmul.bf16.vlgmr.msra.gmra.mxu3 %v1078_v2  ;;  %v2874_v41 = vld [vmem:[#allocation7 + $0x3d8] sm:$0xf0] }
 0x3c1   :  { %1619 = vmatpush.bf16.msrb.mxu0 %v2809_v61  ;;  %v2877_v2 = vor.u32 %v3227_v40, %v2874_v41  ;;  %1633 = vmatpush.bf16.msrb.mxu1 %v2873_v38  ;;  %v2781_v61 = vor.u32 %v3203_v57, %v2778_v36  ;;  %v2845_v38 = vor.u32 %v3219_v37, %v2842_v62  ;;  %v2832_v40 = vld [vmem:[#allocation7 + $0x380] sm:$0xf]  ;;  %v3218_v41 = vld [vmem:[#allocation7 + $0x384] sm:$0xf0] }
 0x3c2   :  { %1647 = vmatpush.bf16.msrb.mxu2 %v2813_v39  ;;  %v3202_v39 = vld [vmem:[#allocation7 + $0x304] sm:$0xf0] }
 0x3c3   :  { %1661 = vmatpush.bf16.msrb.mxu3 %v2877_v2 }
 0x43c   :  { %v1288_v43 = vpop.f32.mrf.mxu0  ;;  %v1302_v6 = vpop.f32.mrf.mxu1 }
 0x43d   :  { %v1289_v44 = vadd.f32 %v1288_v43, %v1115_v42  ;;  %v2864_v43 = vld [vmem:[#allocation7 + $0x3c0] sm:$0xf] }
 0x43f   :  { %v3746_v47 = vadd.f32 %v1302_v6, %v1289_v44  ;;  %v3209_v6 = vld [vmem:[#allocation7 + $0x344] sm:$0xf] }
 0x441   :  { %v1343_v52 = vmul.f32 %v3746_v47, %v3746_v47 }
 0x443   :  { %v1316_v11 = vpop.f32.mrf.mxu2  ;;  %v1330_v46 = vpop.f32.mrf.mxu3 }
 0x444   :  { %v1317_v48 = vadd.f32 %v1316_v11, %v1116_v45  ;;  %v1290_v49 = vpop.f32.mrf.mxu0  ;;  %v1304_v56 = vpop.f32.mrf.mxu1  ;;  %v2802_v11 = vld [vmem:[#allocation7 + $0x348] sm:$0xf0] }
 0x445   :  { %v1291_v8 = vadd.f32 %v1290_v49, %v1115_v42  ;;  %v3210_v42 = vld [vmem:[#allocation7 + $0x344] sm:$0xf0]  ;;  %v3225_v49 = vld [vmem:[#allocation7 + $0x3c4] sm:$0xf] }
 0x446   :  { %v3748_v7 = vadd.f32 %v1330_v46, %v1317_v48  ;;  %v2801_v44 = vor.u32 %v3210_v42, %v2800_v5  ;;  %v2805_v48 = vor.u32 %v3209_v6, %v2802_v11  ;;  %v2769_v5 = vor.u32 %v3202_v39, %v2768_v29  ;;  %v3217_v11 = vld [vmem:[#allocation7 + $0x384] sm:$0xf] }
 0x447   :  { %v3756_v59 = vadd.f32 %v1304_v56, %v1291_v8  ;;  %v2866_v8 = vld [vmem:[#allocation7 + $0x3c8] sm:$0xf0]  ;;  %v2833_v42 = vor.u32 %v3218_v41, %v2832_v40 }
 0x448   :  { %v1335_v50 = vadd.f32 %v3748_v7, %v3746_v47  ;;  %v1344_v53 = vmul.f32 %v3748_v7, %v3748_v7  ;;  %1620 = vmatpush.bf16.msrb.mxu0 %v2801_v44  ;;  %1648 = vmatpush.bf16.msrb.mxu2 %v2805_v48  ;;  %v2770_v44 = vld [vmem:[#allocation7 + $0x308] sm:$0xf0] }
 0x449   :  { %v1345_v4 = vmul.f32 %v3756_v59, %v3756_v59 }
 0x44a   :  { %1336 = vadd.xlane.f32.xlu0 %v1335_v50  ;;  %v1347_v55 = vadd.f32 %v1344_v53, %v1343_v52  ;;  %v2869_v50 = vor.u32 %v3225_v49, %v2866_v8  ;;  %v2792_v52 = vld [vmem:[#allocation7 + $0x330] sm:$0xf]  ;;  %v3208_v53 = vld [vmem:[#allocation7 + $0x334] sm:$0xf0] }
 0x44b   :  { %v1318_v58 = vpop.f32.mrf.mxu2  ;;  %v1332_v0 = vpop.f32.mrf.mxu3  ;;  %v2793_v56 = vor.u32 %v3208_v53, %v2792_v52 }
 0x44c   :  { %v1319_v63 = vadd.f32 %v1318_v58, %v1116_v45  ;;  %1348 = vadd.xlane.f32.xlu2 %v1347_v55  ;;  %v3226_v45 = vld [vmem:[#allocation7 + $0x3c4] sm:$0xf0]  ;;  %v2856_v55 = vld [vmem:[#allocation7 + $0x3b0] sm:$0xf]  ;;  %1662 = vmatpush.bf16.msrb.mxu3 %v2869_v50  ;;  %v3224_v58 = vld [vmem:[#allocation7 + $0x3b4] sm:$0xf0] }
 0x44d   :  { %v2865_v46 = vor.u32 %v3226_v45, %v2864_v43  ;;  %1621 = vmatpush.bf16.msrb.mxu0 %v2793_v56  ;;  %v3201_v43 = vld [vmem:[#allocation7 + $0x304] sm:$0xf] }
 0x44e   :  { %v3758_v1 = vadd.f32 %v1332_v0, %v1319_v63  ;;  %v3207_v63 = vld [vmem:[#allocation7 + $0x334] sm:$0xf]  ;;  %v2794_v0 = vld [vmem:[#allocation7 + $0x338] sm:$0xf0]  ;;  %v2773_v6 = vor.u32 %v3201_v43, %v2770_v44 }
 0x44f   :  { %1634 = vmatpush.bf16.msrb.mxu1 %v2865_v46  ;;  %v2834_v46 = vld [vmem:[#allocation7 + $0x388] sm:$0xf0] }
 0x450   :  { %v1338_v3 = vadd.f32 %v3758_v1, %v3756_v59  ;;  %v1346_v9 = vmul.f32 %v3758_v1, %v3758_v1  ;;  %v2837_v49 = vor.u32 %v3217_v11, %v2834_v46 }
 0x451   :  { %1622 = vmatpush.bf16.msrb.mxu0 %v2785_v18 }
 0x452   :  { %1339 = vadd.xlane.f32.xlu1 %v1338_v3  ;;  %v1350_v10 = vadd.f32 %v1346_v9, %v1345_v4  ;;  %v2857_v3 = vor.u32 %v3224_v58, %v2856_v55  ;;  %v2797_v4 = vor.u32 %v3207_v63, %v2794_v0  ;;  %v3223_v9 = vld [vmem:[#allocation7 + $0x3b4] sm:$0xf] }
 0x454   :  { %1351 = vadd.xlane.f32.xlu0 %v1350_v10  ;;  %v2858_v10 = vld [vmem:[#allocation7 + $0x3b8] sm:$0xf0]  ;;  %1635 = vmatpush.bf16.msrb.mxu1 %v2857_v3 }
 0x455   :  { %v2861_v12 = vor.u32 %v3223_v9, %v2858_v10  ;;  %1649 = vmatpush.bf16.msrb.mxu2 %v2797_v4  ;;  %1623 = vmatpush.bf16.msrb.mxu0 %v2777_v54 }
 0x457   :  { %1663 = vmatpush.bf16.msrb.mxu3 %v2861_v12 }
 0x458   :  { %1636 = vmatpush.bf16.msrb.mxu1 %v2849_v24  ;;  %v1401_v24 = vld [vmem:[#allocation10 + $0x3] ss:$8 sm:$0x3] }
 0x459   :  { %1650 = vmatpush.bf16.msrb.mxu2 %v2789_v26  ;;  %1624 = vmatpush.bf16.msrb.mxu0 %v2769_v5  ;;  %v1393_v26 = vperm.slane %v1390_v15, 1  ;;  %v3264_v15 = vld [vmem:[#allocation7 + $0x4f4] sm:$0xf0] }
 0x45b   :  { %1664 = vmatpush.bf16.msrb.mxu3 %v2853_v14  ;;  %v1404_v14 = vperm.slane %v1401_v24, 1 }
 0x45c   :  { %1637 = vmatpush.bf16.msrb.mxu1 %v2841_v27 }
 0x45d   :  { %1651 = vmatpush.bf16.msrb.mxu2 %v2781_v61 }
 0x45f   :  { %1665 = vmatpush.bf16.msrb.mxu3 %v2845_v38 }
 0x460   :  { %1638 = vmatpush.bf16.msrb.mxu1 %v2833_v42 }
 0x461   :  { %1652 = vmatpush.bf16.msrb.mxu2 %v2773_v6 }
 0x463   :  { %1666 = vmatpush.bf16.msrb.mxu3 %v2837_v49 }
 0x4bd   :  { %v1337_v17 = vpop.xlane.xlu0 %1336 }
 0x4be   :  { %v3767_v23 = vmul.f32 %v1337_v17, %v3653_v19 }
 0x4bf   :  { %v1349_v31 = vpop.xlane.xlu2 %1348 }
 0x4c0   :  { %v1353_v32 = vmul.f32 %v1349_v31, %v3653_v19  ;;  %v1355_v33 = vmul.f32 %v3767_v23, %v3767_v23  ;;  %v1359_v16 = vsub.f32 %v3746_v47, %v3767_v23  ;;  %v1360_v17 = vsub.f32 %v3748_v7, %v3767_v23 }
 0x4c1   :  { %v1403_v31 = vperm.slane %v1401_v24, 0 }
 0x4c2   :  { %v1357_v60 = vsub.f32 %v1353_v32, %v1355_v33 }
 0x4c4   :  { %v1363_v2 = vadd.f32 1e-05, %v1357_v60 }
 0x4c5   :  { %v1340_v45 = vpop.xlane.xlu1 %1339 }
 0x4c6   :  { %3308 = vrsqrt.f32 %v1363_v2  ;;  %v1342_v48 = vmul.f32 %v1340_v45, %v3653_v19  ;;  %vm1371_vm6 = vweird.f32 %v1363_v2 }
 0x4c7   :  { %v1352_v8 = vpop.xlane.xlu0 %1351 }
 0x4c8   :  { %v1356_v50 = vmul.f32 %v1342_v48, %v1342_v48  ;;  %v1354_v52 = vmul.f32 %v1352_v8, %v3653_v19  ;;  %v1361_v32 = vsub.f32 %v3756_v59, %v1342_v48  ;;  %v1362_v33 = vsub.f32 %v3758_v1, %v1342_v48  ;;  %v2765_v1 = vld [vmem:[%s3880_s7 + $0x3] ss:$8 sm:$0x3] }
 0x4c9   :  { %v1453_v38 = vperm.slane %v2765_v1, 0  ;;  %v1454_v41 = vperm.slane %v2765_v1, 1  ;;  %v2929_v1 = vld [vmem:[#allocation7 + $0x440] sm:$0xf] }
 0x4ca   :  { %v1358_v53 = vsub.f32 %v1354_v52, %v1356_v50 }
 0x4cc   :  { %v3309_v55 = vpop.eup %3308  ;;  %v1364_v56 = vadd.f32 1e-05, %v1358_v53 }
 0x4cd   :  { %v1366_v58 = vmul.f32 %v3309_v55, %v1363_v2  ;;  %vm1372_vm5 = vweird.f32 %v3309_v55 }
 0x4ce   :  { %3310 = vrsqrt.f32 %v1364_v56  ;;  %vm1373_vm7 = vmor %vm1371_vm6, %vm1372_vm5  ;;  %vm1381_vm9 = vweird.f32 %v1364_v56 }
 0x4cf   :  { %v1367_v63 = vmul.f32 %v3309_v55, %v1366_v58 }
 0x4d1   :  { %v1368_v0 = vmul.f32 0.5, %v1367_v63 }
 0x4d3   :  { %v1369_v3 = vsub.f32 1.5, %v1368_v0 }
 0x4d4   :  { %v3311_v4 = vpop.eup %3310 }
 0x4d5   :  { %v1370_v9 = vmul.f32 %v3309_v55, %v1369_v3  ;;  %v1376_v10 = vmul.f32 %v3311_v4, %v1364_v56  ;;  %vm1382_vm8 = vweird.f32 %v3311_v4 }
 0x4d6   :  { %vm1383_vm10 = vmor %vm1381_vm9, %vm1382_vm8 }
 0x4d7   :  { %v1374_v12 = vsel %vm1373_vm7, %v3309_v55, %v1370_v9  ;;  %v1377_v13 = vmul.f32 %v3311_v4, %v1376_v10  ;;  %v2953_v9 = vld [vmem:[#allocation7 + $0x470] sm:$0xf]  ;;  %v3248_v10 = vld [vmem:[#allocation7 + $0x474] sm:$0xf0] }
 0x4d8   :  { %v1385_v20 = vmul.f32 %v1374_v12, %v1359_v16  ;;  %v1386_v21 = vmul.f32 %v1374_v12, %v1360_v17  ;;  %v3017_v12 = vld [vmem:[#allocation7 + $0x4f0] sm:$0xf]  ;;  %v3247_v16 = vld [vmem:[#allocation7 + $0x474] sm:$0xf]  ;;  %v2955_v17 = vld [vmem:[#allocation7 + $0x478] sm:$0xf0] }
 0x4d9   :  { %v1378_v18 = vmul.f32 0.5, %v1377_v13  ;;  %v2954_v13 = vor.u32 %v3248_v10, %v2953_v9  ;;  %v2913_v10 = vld [vmem:[#allocation7 + $0x420] sm:$0xf] }
 0x4da   :  { %v1396_v47 = vmul.f32 %v1392_v22, %v1385_v20  ;;  %v1397_v34 = vmul.f32 %v1393_v26, %v1386_v21  ;;  %v2958_v20 = vor.u32 %v3247_v16, %v2955_v17  ;;  %v3263_v21 = vld [vmem:[#allocation7 + $0x4f4] sm:$0xf]  ;;  %v3254_v17 = vld [vmem:[#allocation7 + $0x4a4] sm:$0xf0] }
 0x4db   :  { %v1379_v28 = vsub.f32 1.5, %v1378_v18  ;;  %v3018_v18 = vor.u32 %v3264_v15, %v3017_v12  ;;  %1955 = vmatpush.bf16.msra.mxu0 %v2954_v13  ;;  %v3238_v12 = vld [vmem:[#allocation7 + $0x424] sm:$0xf0]  ;;  %v2977_v13 = vld [vmem:[#allocation7 + $0x4a0] sm:$0xf] }
 0x4dc   :  { %v1407_v54 = vadd.f32 %v1403_v31, %v1396_v47  ;;  %v1408_v57 = vadd.f32 %v1404_v14, %v1397_v34  ;;  %1983 = vmatpush.bf16.msra.mxu2 %v2958_v20  ;;  %v2914_v16 = vor.u32 %v3238_v12, %v2913_v10  ;;  %v2915_v20 = vld [vmem:[#allocation7 + $0x428] sm:$0xf0] }
 0x4dd   :  { %v1380_v30 = vmul.f32 %v3311_v4, %v1379_v28  ;;  %1969 = vmatpush.bf16.msra.mxu1 %v3018_v18  ;;  %v3246_v28 = vld [vmem:[#allocation7 + $0x464] sm:$0xf0]  ;;  %v3237_v18 = vld [vmem:[#allocation7 + $0x424] sm:$0xf] }
 0x4de   :  { %v1411_v27 = vmax.f32 %v1407_v54, 0.0  ;;  %v1412_v37 = vmax.f32 %v1408_v57, 0.0  ;;  %v3244_v54 = vld [vmem:[#allocation7 + $0x454] sm:$0xf0] }
 0x4df   :  { %v1384_v7 = vsel %vm1383_vm10, %v3311_v4, %v1380_v30  ;;  %v3009_v30 = vld [vmem:[#allocation7 + $0x4e0] sm:$0xf]  ;;  %v1728_v12 = vld [vmem:[#allocation8 + $0x4] ss:$8 sm:$0x3] }
 0x4e0   :  { %v1387_v23 = vmul.f32 %v1384_v7, %v1361_v32  ;;  %v1388_v51 = vmul.f32 %v1384_v7, %v1362_v33  ;;  %v3245_v32 = vld [vmem:[#allocation7 + $0x464] sm:$0xf]  ;;  %v2947_v33 = vld [vmem:[#allocation7 + $0x468] sm:$0xf0] }
 0x4e1   :  { %v2950_v34 = vor.u32 %v3245_v32, %v2947_v33  ;;  %v3261_v7 = vld [vmem:[#allocation7 + $0x4e4] sm:$0xf]  ;;  %v2905_v33 = vld [vmem:[#allocation7 + $0x410] sm:$0xf] }
 0x4e2   :  { %v1398_v35 = vmul.f32 %v1392_v22, %v1387_v23  ;;  %v1399_v25 = vmul.f32 %v1393_v26, %v1388_v51  ;;  %v3019_v22 = vld [vmem:[#allocation7 + $0x4f8] sm:$0xf0]  ;;  %v2945_v26 = vld [vmem:[#allocation7 + $0x460] sm:$0xf]  ;;  %v3011_v23 = vld [vmem:[#allocation7 + $0x4e8] sm:$0xf0] }
 0x4e3   :  { %v3022_v24 = vor.u32 %v3263_v21, %v3019_v22  ;;  %v3014_v51 = vor.u32 %v3261_v7, %v3011_v23  ;;  %1984 = vmatpush.bf16.msra.mxu2 %v2950_v34  ;;  %v2978_v22 = vor.u32 %v3254_v17, %v2977_v13  ;;  %v2969_v34 = vld [vmem:[#allocation7 + $0x490] sm:$0xf]  ;;  %v3252_v23 = vld [vmem:[#allocation7 + $0x494] sm:$0xf0] }
 0x4e4   :  { %v1409_v36 = vadd.f32 %v1403_v31, %v1398_v35  ;;  %v1410_v60 = vadd.f32 %v1404_v14, %v1399_v25  ;;  %v2946_v31 = vor.u32 %v3246_v28, %v2945_v26  ;;  %v3262_v14 = vld [vmem:[#allocation7 + $0x4e4] sm:$0xf0]  ;;  %v2937_v35 = vld [vmem:[#allocation7 + $0x450] sm:$0xf]  ;;  %v3253_v26 = vld [vmem:[#allocation7 + $0x4a4] sm:$0xf] }
 0x4e5   :  { %1997 = vmatpush.bf16.msra.mxu3 %v3022_v24  ;;  %v3010_v47 = vor.u32 %v3262_v14, %v3009_v30  ;;  %v3001_v25 = vld [vmem:[#allocation7 + $0x4d0] sm:$0xf]  ;;  %v2938_v57 = vor.u32 %v3244_v54, %v2937_v35  ;;  %v2918_v24 = vor.u32 %v3237_v18, %v2915_v20  ;;  %v2979_v28 = vld [vmem:[#allocation7 + $0x4a8] sm:$0xf0]  ;;  %v2907_v35 = vld [vmem:[#allocation7 + $0x418] sm:$0xf0] }
 0x4e6   :  { %v1413_v61 = vmax.f32 %v1409_v36, 0.0  ;;  %v1414_v62 = vmax.f32 %v1410_v60, 0.0  ;;  %1956 = vmatpush.bf16.msra.mxu0 %v2946_v31  ;;  %v3260_v36 = vld [vmem:[#allocation7 + $0x4d4] sm:$0xf0]  ;;  %v3243_v60 = vld [vmem:[#allocation7 + $0x454] sm:$0xf]  ;;  %v2982_v31 = vor.u32 %v3253_v26, %v2979_v28 }
 0x4e7   :  { %1970 = vmatpush.bf16.msra.mxu1 %v3010_v47  ;;  %v3236_v47 = vld [vmem:[#allocation7 + $0x414] sm:$0xf0]  ;;  %v1730_v20 = vperm.slane %v1728_v12, 0 }
 0x4e8   :  { %v1415_v29 = vpack.c.bf16 %v1413_v61, %v1411_v27  ;;  %v1416_v59 = vpack.c.bf16 %v1414_v62, %v1412_v37  ;;  %v2939_v27 = vld [vmem:[#allocation7 + $0x458] sm:$0xf0]  ;;  %v3002_v61 = vor.u32 %v3260_v36, %v3001_v25  ;;  %v3259_v62 = vld [vmem:[#allocation7 + $0x4d4] sm:$0xf]  ;;  %v2906_v7 = vor.u32 %v3236_v47, %v2905_v33 }
 0x4e9   :  { %1998 = vmatpush.bf16.msra.mxu3 %v3014_v51  ;;  %v2942_v37 = vor.u32 %v3243_v60, %v2939_v27  ;;  %v3235_v51 = vld [vmem:[#allocation7 + $0x414] sm:$0xf]  ;;  %v2970_v25 = vor.u32 %v3252_v23, %v2969_v34  ;;  %v2971_v60 = vld [vmem:[#allocation7 + $0x498] sm:$0xf0]  ;;  %v2897_v27 = vld [vmem:[#allocation7 + $0x400] sm:$0xf] }
 0x4ea   :  { %1625 = vmatmul.bf16.vlgmr.msrb.gmra.mxu0 %v1415_v29  ;;  %1639 = vmatmul.bf16.vlgmr.msrb.gmra.mxu1 %v1416_v59  ;;  %v3251_v36 = vld [vmem:[#allocation7 + $0x494] sm:$0xf] }
 0x4eb   :  { %1653 = vmatmul.bf16.vlgmr.msrb.gmra.mxu2 %v1415_v29  ;;  %1667 = vmatmul.bf16.vlgmr.msrb.gmra.mxu3 %v1416_v59  ;;  %v3003_v29 = vld [vmem:[#allocation7 + $0x4d8] sm:$0xf0] }
 0x4ec   :  { %1957 = vmatpush.bf16.msra.mxu0 %v2938_v57  ;;  %v3006_v59 = vor.u32 %v3259_v62, %v3003_v29  ;;  %1971 = vmatpush.bf16.msra.mxu1 %v3002_v61  ;;  %v2910_v57 = vor.u32 %v3235_v51, %v2907_v35  ;;  %v2974_v61 = vor.u32 %v3251_v36, %v2971_v60  ;;  %v2961_v62 = vld [vmem:[#allocation7 + $0x480] sm:$0xf]  ;;  %v3250_v29 = vld [vmem:[#allocation7 + $0x484] sm:$0xf0] }
 0x4ed   :  { %1985 = vmatpush.bf16.msra.mxu2 %v2942_v37  ;;  %v3234_v37 = vld [vmem:[#allocation7 + $0x404] sm:$0xf0] }
 0x4ee   :  { %1999 = vmatpush.bf16.msra.mxu3 %v3006_v59 }
 0x567   :  { %v1626_v39 = vpop.f32.mrf.mxu0  ;;  %v1640_v2 = vpop.f32.mrf.mxu1 }
 0x568   :  { %v1627_v40 = vadd.f32 %v1626_v39, %v1453_v38  ;;  %v2993_v39 = vld [vmem:[#allocation7 + $0x4c0] sm:$0xf] }
 0x56a   :  { %v3783_v43 = vadd.f32 %v1640_v2, %v1627_v40  ;;  %v3241_v2 = vld [vmem:[#allocation7 + $0x444] sm:$0xf] }
 0x56c   :  { %v1681_v48 = vmul.f32 %v3783_v43, %v3783_v43 }
 0x56e   :  { %v1654_v5 = vpop.f32.mrf.mxu2  ;;  %v1668_v42 = vpop.f32.mrf.mxu3 }
 0x56f   :  { %v1655_v44 = vadd.f32 %v1654_v5, %v1454_v41  ;;  %v1628_v45 = vpop.f32.mrf.mxu0  ;;  %v1642_v50 = vpop.f32.mrf.mxu1  ;;  %v2931_v5 = vld [vmem:[#allocation7 + $0x448] sm:$0xf0] }
 0x570   :  { %v1629_v11 = vadd.f32 %v1628_v45, %v1453_v38  ;;  %v3242_v38 = vld [vmem:[#allocation7 + $0x444] sm:$0xf0]  ;;  %v3257_v45 = vld [vmem:[#allocation7 + $0x4c4] sm:$0xf] }
 0x571   :  { %v3785_v6 = vadd.f32 %v1668_v42, %v1655_v44  ;;  %v2930_v40 = vor.u32 %v3242_v38, %v2929_v1  ;;  %v2934_v44 = vor.u32 %v3241_v2, %v2931_v5  ;;  %v2898_v1 = vor.u32 %v3234_v37, %v2897_v27  ;;  %v3249_v5 = vld [vmem:[#allocation7 + $0x484] sm:$0xf] }
 0x572   :  { %v3793_v53 = vadd.f32 %v1642_v50, %v1629_v11  ;;  %v2995_v11 = vld [vmem:[#allocation7 + $0x4c8] sm:$0xf0]  ;;  %v2962_v38 = vor.u32 %v3250_v29, %v2961_v62 }
 0x573   :  { %v1673_v46 = vadd.f32 %v3785_v6, %v3783_v43  ;;  %v1682_v49 = vmul.f32 %v3785_v6, %v3785_v6  ;;  %1958 = vmatpush.bf16.msra.mxu0 %v2930_v40  ;;  %1986 = vmatpush.bf16.msra.mxu2 %v2934_v44  ;;  %v2899_v40 = vld [vmem:[#allocation7 + $0x408] sm:$0xf0] }
 0x574   :  { %v1683_v0 = vmul.f32 %v3793_v53, %v3793_v53 }
 0x575   :  { %1674 = vadd.xlane.f32.xlu1 %v1673_v46  ;;  %v1685_v8 = vadd.f32 %v1682_v49, %v1681_v48  ;;  %v2998_v46 = vor.u32 %v3257_v45, %v2995_v11  ;;  %v2921_v48 = vld [vmem:[#allocation7 + $0x430] sm:$0xf]  ;;  %v3240_v49 = vld [vmem:[#allocation7 + $0x434] sm:$0xf0] }
 0x576   :  { %v1656_v52 = vpop.f32.mrf.mxu2  ;;  %v1670_v56 = vpop.f32.mrf.mxu3  ;;  %v2922_v50 = vor.u32 %v3240_v49, %v2921_v48 }
 0x577   :  { %v1657_v55 = vadd.f32 %v1656_v52, %v1454_v41  ;;  %1686 = vadd.xlane.f32.xlu0 %v1685_v8  ;;  %v3258_v41 = vld [vmem:[#allocation7 + $0x4c4] sm:$0xf0]  ;;  %v2985_v8 = vld [vmem:[#allocation7 + $0x4b0] sm:$0xf]  ;;  %2000 = vmatpush.bf16.msra.mxu3 %v2998_v46  ;;  %v3256_v52 = vld [vmem:[#allocation7 + $0x4b4] sm:$0xf0] }
 0x578   :  { %v2994_v42 = vor.u32 %v3258_v41, %v2993_v39  ;;  %1959 = vmatpush.bf16.msra.mxu0 %v2922_v50  ;;  %v3233_v39 = vld [vmem:[#allocation7 + $0x404] sm:$0xf] }
 0x579   :  { %v3795_v58 = vadd.f32 %v1670_v56, %v1657_v55  ;;  %v3239_v55 = vld [vmem:[#allocation7 + $0x434] sm:$0xf]  ;;  %v2923_v56 = vld [vmem:[#allocation7 + $0x438] sm:$0xf0]  ;;  %v2902_v2 = vor.u32 %v3233_v39, %v2899_v40 }
 0x57a   :  { %1972 = vmatpush.bf16.msra.mxu1 %v2994_v42  ;;  %v2963_v42 = vld [vmem:[#allocation7 + $0x488] sm:$0xf0] }
 0x57b   :  { %v1676_v63 = vadd.f32 %v3795_v58, %v3793_v53  ;;  %v1684_v3 = vmul.f32 %v3795_v58, %v3795_v58  ;;  %v2966_v45 = vor.u32 %v3249_v5, %v2963_v42 }
 0x57c   :  { %1960 = vmatpush.bf16.msra.mxu0 %v2914_v16 }
 0x57d   :  { %1677 = vadd.xlane.f32.xlu2 %v1676_v63  ;;  %v1688_v4 = vadd.f32 %v1684_v3, %v1683_v0  ;;  %v2986_v63 = vor.u32 %v3256_v52, %v2985_v8  ;;  %v2926_v0 = vor.u32 %v3239_v55, %v2923_v56  ;;  %v3255_v3 = vld [vmem:[#allocation7 + $0x4b4] sm:$0xf] }
 0x57f   :  { %1689 = vadd.xlane.f32.xlu1 %v1688_v4  ;;  %v2987_v4 = vld [vmem:[#allocation7 + $0x4b8] sm:$0xf0]  ;;  %1973 = vmatpush.bf16.msra.mxu1 %v2986_v63 }
 0x580   :  { %v2990_v9 = vor.u32 %v3255_v3, %v2987_v4  ;;  %1987 = vmatpush.bf16.msra.mxu2 %v2926_v0  ;;  %1961 = vmatpush.bf16.msra.mxu0 %v2906_v7 }
 0x582   :  { %2001 = vmatpush.bf16.msra.mxu3 %v2990_v9 }
 0x583   :  { %1974 = vmatpush.bf16.msra.mxu1 %v2978_v22  ;;  %v1739_v22 = vld [vmem:[#allocation10 + $0x4] ss:$8 sm:$0x3] }
 0x584   :  { %1988 = vmatpush.bf16.msra.mxu2 %v2918_v24  ;;  %1962 = vmatpush.bf16.msra.mxu0 %v2898_v1  ;;  %v1731_v24 = vperm.slane %v1728_v12, 1  ;;  %v3270_v12 = vld [vmem:[#allocation11 + $0x28] sm:$0xff] }
 0x586   :  { %2002 = vmatpush.bf16.msra.mxu3 %v2982_v31  ;;  %v1742_v31 = vperm.slane %v1739_v22, 1 }
 0x587   :  { %1975 = vmatpush.bf16.msra.mxu1 %v2970_v25 }
 0x588   :  { %1989 = vmatpush.bf16.msra.mxu2 %v2910_v57 }
 0x58a   :  { %2003 = vmatpush.bf16.msra.mxu3 %v2974_v61 }
 0x58b   :  { %1976 = vmatpush.bf16.msra.mxu1 %v2962_v38 }
 0x58c   :  { %1990 = vmatpush.bf16.msra.mxu2 %v2902_v2 }
 0x58e   :  { %2004 = vmatpush.bf16.msra.mxu3 %v2966_v45 }
 0x5e8   :  { %v1675_v15 = vpop.xlane.xlu1 %1674 }
 0x5e9   :  { %v3804_v21 = vmul.f32 %v1675_v15, %v3653_v19 }
 0x5ea   :  { %v1687_v30 = vpop.xlane.xlu0 %1686 }
 0x5eb   :  { %v1691_v14 = vmul.f32 %v1687_v30, %v3653_v19  ;;  %v1693_v32 = vmul.f32 %v3804_v21, %v3804_v21  ;;  %v1697_v13 = vsub.f32 %v3783_v43, %v3804_v21  ;;  %v1698_v15 = vsub.f32 %v3785_v6, %v3804_v21 }
 0x5ec   :  { %v1741_v30 = vperm.slane %v1739_v22, 0  ;;  %v3267_v22 = vld [vmem:[#allocation11 + $0x10] sm:$0xff] }
 0x5ed   :  { %v1695_v54 = vsub.f32 %v1691_v14, %v1693_v32 }
 0x5ef   :  { %v1701_v59 = vadd.f32 1e-05, %v1695_v54 }
 0x5f0   :  { %v1678_v41 = vpop.xlane.xlu2 %1677 }
 0x5f1   :  { %3312 = vrsqrt.f32 %v1701_v59  ;;  %v1680_v44 = vmul.f32 %v1678_v41, %v3653_v19  ;;  %vm1709_vm12 = vweird.f32 %v1701_v59 }
 0x5f2   :  { %v1690_v11 = vpop.xlane.xlu1 %1689 }
 0x5f3   :  { %v1694_v46 = vmul.f32 %v1680_v44, %v1680_v44  ;;  %v1692_v48 = vmul.f32 %v1690_v11, %v3653_v19  ;;  %v1699_v14 = vsub.f32 %v3793_v53, %v1680_v44  ;;  %v1700_v32 = vsub.f32 %v3795_v58, %v1680_v44  ;;  %v2894_v58 = vld [vmem:[%s3880_s7 + $0x4] ss:$8 sm:$0x3] }
 0x5f4   :  { %v1791_v61 = vperm.slane %v2894_v58, 0  ;;  %v1792_v29 = vperm.slane %v2894_v58, 1 }
 0x5f5   :  { %v1696_v49 = vsub.f32 %v1692_v48, %v1694_v46 }
 0x5f7   :  { %v3313_v8 = vpop.eup %3312  ;;  %v1702_v50 = vadd.f32 1e-05, %v1696_v49 }
 0x5f8   :  { %v1704_v52 = vmul.f32 %v3313_v8, %v1701_v59  ;;  %vm1710_vm11 = vweird.f32 %v3313_v8 }
 0x5f9   :  { %3314 = vrsqrt.f32 %v1702_v50  ;;  %vm1711_vm13 = vmor %vm1709_vm12, %vm1710_vm11  ;;  %vm1719_vm15 = vweird.f32 %v1702_v50 }
 0x5fa   :  { %v1705_v55 = vmul.f32 %v3313_v8, %v1704_v52 }
 0x5fc   :  { %v1706_v56 = vmul.f32 0.5, %v1705_v55 }
 0x5fe   :  { %v1707_v63 = vsub.f32 1.5, %v1706_v56 }
 0x5ff   :  { %v3315_v0 = vpop.eup %3314 }
 0x600   :  { %v1708_v3 = vmul.f32 %v3313_v8, %v1707_v63  ;;  %v1714_v4 = vmul.f32 %v3315_v0, %v1702_v50  ;;  %vm1720_vm14 = vweird.f32 %v3315_v0 }
 0x601   :  { %vm1721_vm1 = vmor %vm1719_vm15, %vm1720_vm14 }
 0x602   :  { %v1712_v9 = vsel %vm1711_vm13, %v3313_v8, %v1708_v3  ;;  %v1715_v10 = vmul.f32 %v3315_v0, %v1714_v4  ;;  %v3272_v3 = vld [vmem:[#allocation11 + $0x38] sm:$0xff] }
 0x603   :  { %v1723_v17 = vmul.f32 %v1712_v9, %v1697_v13  ;;  %v1724_v18 = vmul.f32 %v1712_v9, %v1698_v15  ;;  %v3280_v4 = vld [vmem:[#allocation11 + $0x78] sm:$0xff]  ;;  %2225 = vmatpush.bf16.msrb.mxu0 %v3272_v3  ;;  %v3271_v9 = vld [vmem:[#allocation11 + $0x30] sm:$0xff]  ;;  %v3278_v13 = vld [vmem:[#allocation11 + $0x68] sm:$0xff] }
 0x604   :  { %v1716_v16 = vmul.f32 0.5, %v1715_v10  ;;  %2239 = vmatpush.bf16.msrb.mxu1 %v3280_v4  ;;  %v3279_v10 = vld [vmem:[#allocation11 + $0x70] sm:$0xff]  ;;  %v3269_v15 = vld [vmem:[#allocation11 + $0x20] sm:$0xff] }
 0x605   :  { %v1734_v43 = vmul.f32 %v1730_v20, %v1723_v17  ;;  %v1735_v33 = vmul.f32 %v1731_v24, %v1724_v18  ;;  %v3268_v17 = vld [vmem:[#allocation11 + $0x18] sm:$0xff] }
 0x606   :  { %v1717_v26 = vsub.f32 1.5, %v1716_v16  ;;  %v3277_v16 = vld [vmem:[#allocation11 + $0x60] sm:$0xff]  ;;  %v3276_v18 = vld [vmem:[#allocation11 + $0x58] sm:$0xff] }
 0x607   :  { %v1745_v7 = vadd.f32 %v1741_v30, %v1734_v43  ;;  %v1746_v51 = vadd.f32 %v1742_v31, %v1735_v33  ;;  %2226 = vmatpush.bf16.msrb.mxu0 %v3271_v9  ;;  %v3265_v33 = vld [vmem:[#allocation11] sm:$0xff] }
 0x608   :  { %v1718_v28 = vmul.f32 %v3315_v0, %v1717_v26  ;;  %2240 = vmatpush.bf16.msrb.mxu1 %v3279_v10 }
 0x609   :  { %v1749_v25 = vmax.f32 %v1745_v7, 0.0  ;;  %v1750_v36 = vmax.f32 %v1746_v51, 0.0 }
 0x60a   :  { %v1722_v6 = vsel %vm1721_vm1, %v3315_v0, %v1718_v28 }
 0x60b   :  { %v1725_v21 = vmul.f32 %v1722_v6, %v1699_v14  ;;  %v1726_v47 = vmul.f32 %v1722_v6, %v1700_v32  ;;  %2227 = vmatpush.bf16.msrb.mxu0 %v3270_v12  ;;  %v3266_v14 = vld [vmem:[#allocation11 + $0x8] sm:$0xff]  ;;  %v3273_v6 = vld [vmem:[#allocation11 + $0x40] sm:$0xff] }
 0x60c   :  { %2241 = vmatpush.bf16.msrb.mxu1 %v3278_v13  ;;  %v3274_v32 = vld [vmem:[#allocation11 + $0x48] sm:$0xff] }
 0x60d   :  { %v1736_v34 = vmul.f32 %v1730_v20, %v1725_v21  ;;  %v1737_v23 = vmul.f32 %v1731_v24, %v1726_v47  ;;  %v3275_v24 = vld [vmem:[#allocation11 + $0x50] sm:$0xff] }
 0x60f   :  { %v1747_v35 = vadd.f32 %v1741_v30, %v1736_v34  ;;  %v1748_v54 = vadd.f32 %v1742_v31, %v1737_v23  ;;  %2228 = vmatpush.bf16.msrb.mxu0 %v3269_v15 }
 0x610   :  { %2242 = vmatpush.bf16.msrb.mxu1 %v3277_v16 }
 0x611   :  { %v1751_v57 = vmax.f32 %v1747_v35, 0.0  ;;  %v1752_v60 = vmax.f32 %v1748_v54, 0.0 }
 0x613   :  { %v1753_v27 = vpack.c.bf16 %v1751_v57, %v1749_v25  ;;  %v1754_v53 = vpack.c.bf16 %v1752_v60, %v1750_v36  ;;  %2229 = vmatpush.bf16.msrb.mxu0 %v3268_v17 }
 0x614   :  { %2243 = vmatpush.bf16.msrb.mxu1 %v3276_v18 }
 0x615   :  { %1963 = vmatmul.bf16.vlgmr.msra.gmra.mxu0 %v1753_v27  ;;  %1977 = vmatmul.bf16.vlgmr.msra.gmra.mxu1 %v1754_v53 }
 0x616   :  { %1991 = vmatmul.bf16.vlgmr.msra.gmra.mxu2 %v1753_v27  ;;  %2005 = vmatmul.bf16.vlgmr.msra.gmra.mxu3 %v1754_v53 }
 0x617   :  { %2230 = vmatpush.bf16.msrb.mxu0 %v3267_v22 }
 0x618   :  { %2244 = vmatpush.bf16.msrb.mxu1 %v3275_v24 }
 0x61b   :  { %2231 = vmatpush.bf16.msrb.mxu0 %v3266_v14 }
 0x61c   :  { %2245 = vmatpush.bf16.msrb.mxu1 %v3274_v32 }
 0x61f   :  { %2232 = vmatpush.bf16.msrb.mxu0 %v3265_v33 }
 0x620   :  { %2246 = vmatpush.bf16.msrb.mxu1 %v3273_v6 }
 0x692   :  { %v1964_v37 = vpop.f32.mrf.mxu0  ;;  %v1978_v59 = vpop.f32.mrf.mxu1 }
 0x693   :  { %v1965_v62 = vadd.f32 %v1964_v37, %v1791_v61 }
 0x695   :  { %v3820_v39 = vadd.f32 %v1978_v59, %v1965_v62 }
 0x697   :  { %v2019_v44 = vmul.f32 %v3820_v39, %v3820_v39 }
 0x699   :  { %v1992_v1 = vpop.f32.mrf.mxu2  ;;  %v2006_v38 = vpop.f32.mrf.mxu3 }
 0x69a   :  { %v1993_v40 = vadd.f32 %v1992_v1, %v1792_v29  ;;  %v1966_v41 = vpop.f32.mrf.mxu0  ;;  %v1980_v46 = vpop.f32.mrf.mxu1 }
 0x69b   :  { %v1967_v5 = vadd.f32 %v1966_v41, %v1791_v61 }
 0x69c   :  { %v3822_v2 = vadd.f32 %v2006_v38, %v1993_v40 }
 0x69d   :  { %v3830_v49 = vadd.f32 %v1980_v46, %v1967_v5  ;;  %v2077_v5 = vld [vmem:[#allocation10 + $0x5] ss:$8 sm:$0x3] }
 0x69e   :  { %v2011_v42 = vadd.f32 %v3822_v2, %v3820_v39  ;;  %v2020_v45 = vmul.f32 %v3822_v2, %v3822_v2  ;;  %v2080_v46 = vperm.slane %v2077_v5, 1 }
 0x69f   :  { %v2021_v56 = vmul.f32 %v3830_v49, %v3830_v49 }
 0x6a0   :  { %2012 = vadd.xlane.f32.xlu2 %v2011_v42  ;;  %v2023_v11 = vadd.f32 %v2020_v45, %v2019_v44 }
 0x6a1   :  { %v1994_v48 = vpop.f32.mrf.mxu2  ;;  %v2008_v50 = vpop.f32.mrf.mxu3 }
 0x6a2   :  { %v1995_v8 = vadd.f32 %v1994_v48, %v1792_v29  ;;  %2024 = vadd.xlane.f32.xlu1 %v2023_v11  ;;  %v2066_v29 = vld [vmem:[#allocation8 + $0x5] ss:$8 sm:$0x3]  ;;  %v2079_v11 = vperm.slane %v2077_v5, 0 }
 0x6a3   :  { %v2068_v41 = vperm.slane %v2066_v29, 0  ;;  %v2069_v42 = vperm.slane %v2066_v29, 1 }
 0x6a4   :  { %v3832_v52 = vadd.f32 %v2008_v50, %v1995_v8 }
 0x6a6   :  { %v2014_v55 = vadd.f32 %v3832_v52, %v3830_v49  ;;  %v2022_v63 = vmul.f32 %v3832_v52, %v3832_v52 }
 0x6a8   :  { %2015 = vadd.xlane.f32.xlu0 %v2014_v55  ;;  %v2026_v0 = vadd.f32 %v2022_v63, %v2021_v56 }
 0x6aa   :  { %2027 = vadd.xlane.f32.xlu2 %v2026_v0 }
 0x713   :  { %v2013_v20 = vpop.xlane.xlu2 %2012 }
 0x714   :  { %v2017_v26 = vmul.f32 %v2013_v20, %v3653_v19 }
 0x715   :  { %v2025_v28 = vpop.xlane.xlu1 %2024 }
 0x716   :  { %v2029_v30 = vmul.f32 %v2025_v28, %v3653_v19  ;;  %v2031_v31 = vmul.f32 %v2017_v26, %v2017_v26  ;;  %v2035_v59 = vsub.f32 %v3820_v39, %v2017_v26 }
 0x718   :  { %v2033_v43 = vsub.f32 %v2029_v30, %v2031_v31 }
 0x71a   :  { %v2039_v21 = vadd.f32 1e-05, %v2033_v43 }
 0x71b   :  { %v2016_v47 = vpop.xlane.xlu0 %2015 }
 0x71c   :  { %3316 = vrsqrt.f32 %v2039_v21  ;;  %v2018_v34 = vmul.f32 %v2016_v47, %v3653_v19  ;;  %vm2047_vm3 = vweird.f32 %v2039_v21  ;;  %v2255_v47 = vld [vmem:[%s3875_s2] sm:$0xff] }
 0x71d   :  { %v2028_v7 = vpop.xlane.xlu2 %2027 }
 0x71e   :  { %v2032_v23 = vmul.f32 %v2018_v34, %v2018_v34  ;;  %v2030_v51 = vmul.f32 %v2028_v7, %v3653_v19  ;;  %v2036_v19 = vsub.f32 %v3822_v2, %v2017_v26  ;;  %v2037_v48 = vsub.f32 %v3830_v49, %v2018_v34 }
 0x71f   :  { %v2038_v8 = vsub.f32 %v3832_v52, %v2018_v34  ;;  %v3293_v52 = vld [vmem:[%s3884_s11] ss:$0 sm:$0xff] }
 0x720   :  { %v2034_v35 = vsub.f32 %v2030_v51, %v2032_v23  ;;  %v2256_v51 = vld [vmem:[%s3875_s2 + $0x8] sm:$0xff] }
 0x722   :  { %v3317_v54 = vpop.eup %3316  ;;  %v2040_v25 = vadd.f32 1e-05, %v2034_v35 }
 0x723   :  { %v2042_v57 = vmul.f32 %v3317_v54, %v2039_v21  ;;  %vm2048_vm2 = vweird.f32 %v3317_v54 }
 0x724   :  { %3318 = vrsqrt.f32 %v2040_v25  ;;  %vm2049_vm4 = vmor %vm2047_vm3, %vm2048_vm2  ;;  %vm2057_vm6 = vweird.f32 %v2040_v25 }
 0x725   :  { %v2043_v36 = vmul.f32 %v3317_v54, %v2042_v57 }
 0x727   :  { %v2044_v60 = vmul.f32 0.5, %v2043_v36 }
 0x729   :  { %v2045_v27 = vsub.f32 1.5, %v2044_v60 }
 0x72a   :  { %v3319_v53 = vpop.eup %3318 }
 0x72b   :  { %v2046_v58 = vmul.f32 %v3317_v54, %v2045_v27  ;;  %v2052_v61 = vmul.f32 %v3319_v53, %v2040_v25  ;;  %vm2058_vm5 = vweird.f32 %v3319_v53 }
 0x72c   :  { %vm2059_vm7 = vmor %vm2057_vm6, %vm2058_vm5 }
 0x72d   :  { %v2050_v37 = vsel %vm2049_vm4, %v3317_v54, %v2046_v58  ;;  %v2053_v62 = vmul.f32 %v3319_v53, %v2052_v61 }
 0x72e   :  { %v2061_v38 = vmul.f32 %v2050_v37, %v2035_v59  ;;  %v2062_v40 = vmul.f32 %v2050_v37, %v2036_v19 }
 0x72f   :  { %v2054_v1 = vmul.f32 0.5, %v2053_v62 }
 0x730   :  { %v2072_v39 = vmul.f32 %v2068_v41, %v2061_v38  ;;  %v2073_v50 = vmul.f32 %v2069_v42, %v2062_v40 }
 0x731   :  { %v2055_v44 = vsub.f32 1.5, %v2054_v1 }
 0x732   :  { %v2083_v0 = vadd.f32 %v2079_v11, %v2072_v39  ;;  %v2084_v4 = vadd.f32 %v2080_v46, %v2073_v50 }
 0x733   :  { %v2056_v45 = vmul.f32 %v3319_v53, %v2055_v44 }
 0x734   :  { %v2087_v12 = vmax.f32 %v2083_v0, 0.0  ;;  %v2088_v15 = vmax.f32 %v2084_v4, 0.0 }
 0x735   :  { %v2060_v2 = vsel %vm2059_vm7, %v3319_v53, %v2056_v45 }
 0x736   :  { %v2063_v55 = vmul.f32 %v2060_v2, %v2037_v48  ;;  %v2064_v56 = vmul.f32 %v2060_v2, %v2038_v8 }
 0x738   :  { %v2074_v63 = vmul.f32 %v2068_v41, %v2063_v55  ;;  %v2075_v3 = vmul.f32 %v2069_v42, %v2064_v56 }
 0x73a   :  { %v2085_v9 = vadd.f32 %v2079_v11, %v2074_v63  ;;  %v2086_v10 = vadd.f32 %v2080_v46, %v2075_v3 }
 0x73c   :  { %v2089_v13 = vmax.f32 %v2085_v9, 0.0  ;;  %v2090_v16 = vmax.f32 %v2086_v10, 0.0 }
 0x73e   :  { %v2091_v17 = vpack.c.bf16 %v2089_v13, %v2087_v12  ;;  %v2092_v49 = vpack.c.bf16 %v2090_v16, %v2088_v15 }
 0x740   :  { %2233 = vmatmul.bf16.vlgmr.msrb.gmra.mxu0 %v2091_v17  ;;  %2247 = vmatmul.bf16.vlgmr.msrb.gmra.mxu1 %v2092_v49 }
 0x7bd   :  { %v2234_v18 = vpop.f32.mrf.mxu0  ;;  %v2248_v20 = vpop.f32.mrf.mxu1 }
 0x7be   :  { %v2235_v22 = vadd.f32 %v3293_v52, %v2234_v18 }
 0x7c0   :  { %v2249_v24 = vadd.f32 %v2248_v20, %v2235_v22 }
 0x7c2   :  { %2253 = vst [vmem:[%s3885_s12] sm:$0xff] %v2249_v24  ;;  %v2257_v26 = vmul.f32 0.5, %v2249_v24 }
 0x7c4   :  { %v2259_v28 = vmul.f32 1.442695, %v2257_v26 }
 0x7c5   :  { %v2236_v30 = vpop.f32.mrf.mxu0  ;;  %v2250_v14 = vpop.f32.mrf.mxu1 }
 0x7c6   :  { %3320 = vpow2.f32 %v2259_v28  ;;  %v2237_v31 = vadd.f32 %v3293_v52, %v2236_v30 }
 0x7c8   :  { %v2251_v32 = vadd.f32 %v2250_v14, %v2237_v31 }
 0x7ca   :  { %2254 = vst [vmem:[%s3885_s12 + $0x8] sm:$0xff] %v2251_v32  ;;  %v2258_v43 = vmul.f32 0.5, %v2251_v32 }
 0x7cc   :  { %v3321_v33 = vpop.eup %3320  ;;  %v2261_v6 = vmul.f32 1.442695, %v2258_v43 }
 0x7cd   :  { %2265 = vrot.lane.b32.xlu0 %v3321_v33, %s3510_s21 }
 0x7ce   :  { %3322 = vpow2.f32 %v2261_v6 }
 0x7d4   :  { %v3323_v21 = vpop.eup %3322 }
 0x7d5   :  { %2267 = vrot.lane.b32.xlu1 %v3323_v21, %s3510_s21  ;;  %s2285_s21 = sshll.u32 %s3886_s13, 4  ;;  %s2286_s21 = int_to_ptr.hbm [resolvable:$true] %s2285_s21 }
 0x83f   :  { %v2266_v34 = vpop.permute.xlu0 %2265 }
 0x840   :  { %v2271_v7 = vmul.f32 %v2266_v34, %v2255_v47 }
 0x842   :  { %v2273_v23 = vadd.f32 %v2271_v7, %v2249_v24 }
 0x844   :  { %2275 = vst.msk [vmem:[#allocation13] sm:$0xff] %vm200_vm0, %v2273_v23 }
 0x847   :  { %v2268_v35 = vpop.permute.xlu1 %2267 }
 0x848   :  { %v2272_v54 = vmul.f32 %v2268_v35, %v2256_v51 }
 0x84a   :  { %v2274_v25 = vadd.f32 %v2272_v54, %v2251_v32 }
 0x84c   :  { %2276 = vst.msk [vmem:[#allocation13 + $0x8] sm:$0xff] %vm200_vm0, %v2274_v25 }
 0x84d   :  { %2291 = dma.vmem_to_hbm [thread:$0]  %s2284_s4, 256, %s2286_s21, [#allocation4], %s3503_s16, %s3503_s16, %s3504_s17  }
 0x84e   :  { %3500 = dma.done.wait [#allocation4], 256  }
 0x84f   :  { %3501 = vsyncadd [#allocation4], 4294967040 }
 0x850   :  { %2298 = vsyncpa [#allocation3], 1 }
 0x851   :  { %2299 = vsyncpa [#allocation6], 1 }
 0x852   :  { %2300 = vsyncpa [#allocation9], 1 }
 0x853   :  { %2301 = vsyncpa [#allocation12], 1 }
 0x854   :  { %2302 = vsyncpa [#allocation4], 1 }

</bundles_post_ra>
